<compile_context>
chip_gen: v5e
topology: v5e:2x2
jax: 0.10.0
libtpu: 0.0.40
codegen_flags: <defaults>
</compile_context>

<pallas_src>
import functools

import jax
import jax.numpy as jnp
from jax.experimental import pallas as pl
from jax.experimental.pallas import tpu as pltpu


# (dh, dw) tap order: kh-major, kw-minor — must match conv weight prep and the
# precomputed tap masks.
_TAPS = tuple((dh, dw) for dh in (-1, 0, 1) for dw in (-1, 0, 1))


# ---------------------------------------------------------------------------
# Fused whole-network kernel
# ---------------------------------------------------------------------------
def _make_fused_kernel(N, H, W, Cp, C1, C2, mode, use_mask, c0, c1):
    """mode: 'compute' (compute_fixed_1batch) or 'forward' (forward/predict).
    use_mask / c0 / c1 are trace-time constants from the x_mask simplification."""
    assert mode in ("compute", "forward")
    HW = H * W
    M = N * HW
    # pltpu.roll wrap-around is only safe because every wrapped lane is killed
    # by a boundary mask; that requires the max |shift| = W+1 to be << HW.
    assert H >= 3 and W >= 3 and (W + 1) < HW

    def conv3x3(x_cm, cin, w_ref, b_ref, tm_ref, tapbuf):
        # Stage the 9 rolled+masked copies into a sublane-aligned scratch and
        # run ONE MXU matmul with K = 9*cin.
        #   out[co, m] = b[co] + sum_{k,ci} Wcat[co, k*cin+ci] * tapbuf[k*cin+ci, m]
        for k, (dh, dw) in enumerate(_TAPS):
            s = dh * W + dw
            shifted = x_cm if s == 0 else pltpu.roll(x_cm, shift=(-s) % M, axis=1)
            if (dh, dw) != (0, 0):                     # center-tap mask == 1
                shifted = shifted * tm_ref[k]
            tapbuf[k * cin:(k + 1) * cin, :] = shifted
        pre = jnp.dot(w_ref[...], tapbuf[0:9 * cin, :],
                      preferred_element_type=jnp.float32)
        return pre + b_ref[...]                        # folded-BN shift

    def mask_and_relu(pre, m_ref):
        # DualNet.x_mask + forward-pre-hook, simplified at trace time:
        #   balance=True  -> masked == pre (terms cancel exactly, value-wise)
        #   balance=False -> pre * (1 + eta_float + (eta_fixed - eta_float)*m)
        if use_mask:
            pre = pre * (c0 + c1 * m_ref[...].astype(jnp.float32))
        elif c0 != 1.0:
            pre = pre * c0
        return jnp.maximum(pre, 0.0)                   # module.Act (ReLU)

    def fixed_conv(pre):
        # _fixed_1batch with gamma=[0]: sample-0 pattern tiled over the batch;
        # one full-width lane-dense compare (ties at 0 map to 0).
        pat = jnp.concatenate([pre[:, :HW]] * N, axis=1)
        return ((pat * pre) > 0).astype(jnp.bfloat16)

    def kernel(*refs):
        (x_ref, ns_ref, nb_ref, tm_ref,
         w1_ref, b1_ref, w2_ref, b2_ref, wf1_hbm, b3_ref) = refs[:10]
        i = 10
        if mode == "forward":
            wf2_ref, bo_ref = refs[i], refs[i + 1]
            i += 2
        if use_mask:
            m1_ref, m2_ref, m3_ref = refs[i], refs[i + 1], refs[i + 2]
            i += 3
        if mode == "compute":
            f1_ref, f2_ref, f3_ref = refs[i], refs[i + 1], refs[i + 2]
            i += 3
        else:
            out_ref = refs[i]
            i += 1
        tapbuf, wf1_vmem, wf1_sem = refs[i], refs[i + 1], refs[i + 2]

        # Overlap the dominant FC1 weight DMA with the conv compute.
        wf1_cp = pltpu.make_async_copy(wf1_hbm, wf1_vmem, wf1_sem.at[0])
        wf1_cp.start()

        # norm_layer: per-channel standardization (padded channels stay zero)
        xn = x_ref[...] * ns_ref[...] + nb_ref[...]

        # --- ConvBlock 1: pre = BN(LT(x)); hook-masked Act ---
        pre1 = conv3x3(xn, Cp, w1_ref, b1_ref, tm_ref, tapbuf)
        if mode == "compute":
            f1_ref[...] = fixed_conv(pre1)
            h1 = jnp.maximum(pre1, 0.0)
        else:
            h1 = mask_and_relu(pre1, m1_ref if use_mask else None)

        # --- ConvBlock 2 ---
        pre2 = conv3x3(h1, C1, w2_ref, b2_ref, tm_ref, tapbuf)
        if mode == "compute":
            f2_ref[...] = fixed_conv(pre2)
            h2 = jnp.maximum(pre2, 0.0)
        else:
            h2 = mask_and_relu(pre2, m2_ref if use_mask else None)

        # --- LinearBlock: flat[n, c*HW+p] assembled in-register from aligned
        # lane slices (no scratch, no masked store chain), one bf16 MXU matmul.
        flat = jnp.concatenate(
            [jnp.concatenate([h2[c:c + 1, n * HW:(n + 1) * HW]
                              for c in range(C2)], axis=1)
             for n in range(N)], axis=0)               # (N, C2*HW)
        wf1_cp.wait()
        pre3 = jnp.dot(flat.astype(jnp.bfloat16), wf1_vmem[...],
                       preferred_element_type=jnp.float32) + b3_ref[...]
        if mode == "compute":
            f3_ref[...] = ((pre3[0:1, :] * pre3) > 0).astype(jnp.bfloat16)
            return        # compute_fixed_1batch only returns the fixed masks
        h3 = mask_and_relu(pre3, m3_ref if use_mask else None)

        # --- Final Linear (layers[-1], not a "block": no Act, no hook).
        # Output columns pre-padded to 128 lanes -> unmasked store.
        out_ref[...] = jnp.dot(h3, wf2_ref[...],
                               preferred_element_type=jnp.float32) + bo_ref[...]

    return kernel


def _full_spec(shape):
    zeros = (0,) * len(shape)
    return pl.BlockSpec(tuple(shape), lambda i, _z=zeros: _z)


def _to_cm(x):
    """NCHW -> (C, N*H*W): channels on sublanes, N*H*W on the 128-lane axis."""
    N, C, H, W = x.shape
    return x.reshape(N, C, H * W).transpose(1, 0, 2).reshape(C, N * H * W)


def _tap_masks(N, H, W):
    """Zero-padding boundary masks, precomputed outside the kernel (constant
    folded by XLA); shape (9, 1, N*H*W), tap order == _TAPS."""
    HW = H * W
    m_idx = jnp.arange(N * HW, dtype=jnp.int32)
    w_idx = m_idx % W
    h_idx = (m_idx // W) % H
    rows = []
    for dh, dw in _TAPS:
        ok = ((h_idx + dh >= 0) & (h_idx + dh < H) &
              (w_idx + dw >= 0) & (w_idx + dw < W))
        rows.append(ok.astype(jnp.float32))
    return jnp.stack(rows)[:, None, :]


def _fused_call(x, kp, mode, use_mask, c0, c1, fixed=None):
    N, Cin, H, W = x.shape
    HW = H * W
    M = N * HW
    Cp = kp["norm_scale"].shape[0]                # zero-padded input channels
    C1 = kp["w1"].shape[0]
    C2 = kp["w2"].shape[0]
    F1 = kp["wf1"].shape[1]
    nclass = kp["wf2"].shape[1]
    F2p = ((nclass + 127) // 128) * 128           # lane-dense logits block

    x_cm = _to_cm(x)
    if Cp > Cin:
        x_cm = jnp.pad(x_cm, ((0, Cp - Cin), (0, 0)))
    tapmask = _tap_masks(N, H, W)
    wf2_p = jnp.pad(kp["wf2"], ((0, 0), (0, F2p - nclass)))
    bo_p = jnp.pad(kp["bo"], ((0, 0), (0, F2p - nclass)))

    inputs, in_specs = [], []

    def add(arr, spec=None):
        inputs.append(arr)
        in_specs.append(_full_spec(arr.shape) if spec is None else spec)

    add(x_cm)
    add(kp["norm_scale"])
    add(kp["norm_shift"])
    add(tapmask)
    add(kp["w1"])
    add(kp["b1"])
    add(kp["w2"])
    add(kp["b2"])
    add(kp["wf1"], pl.BlockSpec(memory_space=pl.ANY))   # stays in HBM, manual DMA
    add(kp["b3"])
    if mode == "forward":
        add(wf2_p)
        add(bo_p)
    if use_mask:
        for m in fixed:
            add(m)

    if mode == "compute":
        out_shape = (jax.ShapeDtypeStruct((C1, M), jnp.bfloat16),
                     jax.ShapeDtypeStruct((C2, M), jnp.bfloat16),
                     jax.ShapeDtypeStruct((N, F1), jnp.bfloat16))
        out_specs = tuple(_full_spec(s.shape) for s in out_shape)
    else:
        out_shape = jax.ShapeDtypeStruct((N, F2p), jnp.float32)
        out_specs = _full_spec(out_shape.shape)

    kernel = _make_fused_kernel(N, H, W, Cp, C1, C2, mode, use_mask, c0, c1)
    out = pl.pallas_call(
        kernel,
        out_shape=out_shape,
        grid=(1,),
        in_specs=in_specs,
        out_specs=out_specs,
        scratch_shapes=[pltpu.VMEM((9 * max(Cp, C1), M), jnp.float32),  # tap stage
                        pltpu.VMEM(kp["wf1"].shape, jnp.bfloat16),      # wf1 dst
                        pltpu.SemaphoreType.DMA((1,))],
        compiler_params=pltpu.CompilerParams(
            dimension_semantics=("arbitrary",)),
    )(*inputs)
    if mode == "forward":
        out = out[:, :nclass]
    return out


# ---------------------------------------------------------------------------
# Parameters (synthetic net, PyTorch conventions) and one-time prep
# ---------------------------------------------------------------------------
def _bn_affine(gamma, beta, mean, var, eps=1e-5):
    scale = gamma / jnp.sqrt(var + eps)
    shift = beta - mean * scale
    return scale.astype(jnp.float32), shift.astype(jnp.float32)


def init_params(key):
    ks = jax.random.split(key, 16)
    p = {"norm_mean": jnp.array([0.1, 0.2, 0.3, 0.4], jnp.float32),
         "norm_std":  jnp.array([0.5, 0.6, 0.7, 0.8], jnp.float32)}

    def bn(kg, kb, km, kv, c):
        g = 1.0 + 0.1 * jax.random.normal(kg, (c,), jnp.float32)
        b = 0.1 * jax.random.normal(kb, (c,), jnp.float32)
        m = 0.05 * jax.random.normal(km, (c,), jnp.float32)
        v = 0.9 + 0.2 * jax.random.uniform(kv, (c,), jnp.float32)
        return _bn_affine(g, b, m, v)

    p["conv1_w"] = 0.2 * jax.random.normal(ks[0], (8, 4, 3, 3), jnp.float32)
    p["bn1_scale"], p["bn1_shift"] = bn(ks[1], ks[2], ks[3], ks[4], 8)
    p["conv2_w"] = 0.2 * jax.random.normal(ks[5], (8, 8, 3, 3), jnp.float32)
    p["bn2_scale"], p["bn2_shift"] = bn(ks[6], ks[7], ks[8], ks[9], 8)
    p["fc1_w"] = 0.02 * jax.random.normal(ks[10], (32, 8 * 16 * 16), jnp.float32)
    p["bn3_scale"], p["bn3_shift"] = bn(ks[11], ks[12], ks[13], ks[14], 32)
    p["fc2_w"] = 0.1 * jax.random.normal(ks[15], (10, 32), jnp.float32)
    p["fc2_b"] = jnp.linspace(-0.5, 0.5, 10, dtype=jnp.float32)
    return p


def prepare_params(p, cin_pad=8):
    """Fold BN scales into the weights and pre-arrange everything into the
    layouts the fused kernel consumes (done once, outside the hot path)."""
    def conv_cat(w, scale, pad):
        # (Cout, Cin, 3, 3) OIHW, BN scale folded -> (Cout, 9*pad),
        # column = (kh*3 + kw)*pad + ci   (matches _TAPS / tapbuf order)
        ws = w * scale[:, None, None, None]
        cout, cin = ws.shape[0], ws.shape[1]
        wp = jnp.zeros((cout, pad, 3, 3), ws.dtype).at[:, :cin].set(ws)
        return jnp.transpose(wp, (0, 2, 3, 1)).reshape(cout, 9 * pad)

    cin = p["norm_mean"].shape[0]
    cout1 = p["conv1_w"].shape[0]
    ns = jnp.zeros((cin_pad,), jnp.float32).at[:cin].set(1.0 / p["norm_std"])
    nb = jnp.zeros((cin_pad,), jnp.float32).at[:cin].set(
        -p["norm_mean"] / p["norm_std"])

    return {
        "norm_scale": ns.reshape(-1, 1),
        "norm_shift": nb.reshape(-1, 1),
        "w1": conv_cat(p["conv1_w"], p["bn1_scale"], cin_pad),
        "b1": p["bn1_shift"].reshape(-1, 1),
        "w2": conv_cat(p["conv2_w"], p["bn2_scale"], cout1),
        "b2": p["bn2_shift"].reshape(-1, 1),
        # FC1 weight with BN scale folded, (C2*HW, F1), stored bf16 (dominant DMA)
        "wf1": (p["fc1_w"] * p["bn3_scale"][:, None]).T.astype(jnp.bfloat16),
        "b3": p["bn3_shift"].reshape(1, -1),
        "wf2": p["fc2_w"].T,                                   # (32, 10)
        "bo": p["fc2_b"].reshape(1, -1),
    }


# ---------------------------------------------------------------------------
# DualNet API
# ---------------------------------------------------------------------------
@jax.jit
def dualnet_compute_fixed(x, kp):
    """DualNet.compute_fixed_1batch(x): eval forward without masking hooks.
    Returns the per-block fixed-neuron masks (gamma=[0]) as bf16 {0,1} arrays
    in the kernel's internal layouts: (C, N*H*W) for conv blocks, (N, F1) for
    the LinearBlock; None placeholders for non-block layers are omitted."""
    return _fused_call(x, kp, mode="compute", use_mask=False, c0=1.0, c1=0.0)


@functools.partial(jax.jit, static_argnames=("eta_fixed", "eta_float", "balance"))
def dualnet_forward(x, kp, fixed, eta_fixed=0.0, eta_float=0.0, balance=True):
    """DualNet.forward(x, fixed_neurons, eta_fixed, eta_float, balance)."""
    if balance:
        c0, c1 = 1.0, 0.0            # x_mask terms cancel exactly (value-wise)
    else:
        c0 = 1.0 + float(eta_float)
        c1 = float(eta_fixed) - float(eta_float)
    use_mask = c1 != 0.0
    return _fused_call(x, kp, mode="forward", use_mask=use_mask,
                       c0=c0, c1=c1, fixed=fixed if use_mask else None)


def dualnet_predict(x, kp, fixed, eta_fixed, eta_float):
    """DualNet.predict: forward with balance=False."""
    return dualnet_forward(x, kp, fixed, eta_fixed=eta_fixed,
                           eta_float=eta_float, balance=False)


if __name__ == "__main__":
    key = jax.random.PRNGKey(0)
    kx, kparam = jax.random.split(key)
    x = jax.random.normal(kx, (2, 4, 16, 16), jnp.float32)
    kp = prepare_params(init_params(kparam))

    # DualNet.compute_fixed_1batch(x)
    fixed = dualnet_compute_fixed(x, kp)

    # DualNet.forward(x, fixed_neurons, 0.3, 0.1, balance=True)
    out_train = dualnet_forward(x, kp, fixed, eta_fixed=0.3, eta_float=0.1,
                                balance=True)
    # DualNet.predict(x, fixed_neurons, 0.3, 0.1)   (balance=False)
    out_pred = dualnet_predict(x, kp, fixed, eta_fixed=0.3, eta_float=0.1)

    jax.block_until_ready((fixed, out_train, out_pred))
    assert out_train.shape == (2, 10) and out_pred.shape == (2, 10)
    assert bool(jnp.isfinite(out_train).all()) and bool(jnp.isfinite(out_pred).all())
    print("KERNEL_OK")
</pallas_src>

<mosaic_0001>
module attributes {stable_mosaic.version = 11 : i64} {
  func.func @kernel(%arg0: i32, %arg1: memref<8x512xf32, #tpu.memory_space<vmem>>, %arg2: memref<8x1xf32, #tpu.memory_space<vmem>>, %arg3: memref<8x1xf32, #tpu.memory_space<vmem>>, %arg4: memref<9x1x512xf32, #tpu.memory_space<vmem>>, %arg5: memref<8x72xf32, #tpu.memory_space<vmem>>, %arg6: memref<8x1xf32, #tpu.memory_space<vmem>>, %arg7: memref<8x72xf32, #tpu.memory_space<vmem>>, %arg8: memref<8x1xf32, #tpu.memory_space<vmem>>, %arg9: memref<2048x32xbf16, #tpu.memory_space<any>>, %arg10: memref<1x32xf32, #tpu.memory_space<vmem>>, %arg11: memref<8x512xbf16, #tpu.memory_space<vmem>>, %arg12: memref<8x512xbf16, #tpu.memory_space<vmem>>, %arg13: memref<2x32xbf16, #tpu.memory_space<vmem>>, %arg14: memref<72x512xf32, #tpu.memory_space<vmem>>, %arg15: memref<2048x32xbf16, #tpu.memory_space<vmem>>, %arg16: memref<1x!tpu.dma_semaphore, #tpu.memory_space<semaphore_mem>>) attributes {dimension_semantics = [#tpu.dimension_semantics<arbitrary>], iteration_bounds = array<i64: 1>, scalar_prefetch = 0 : i64, scratch_operands = 3 : i64, tpu.core_type = #tpu.core_type<tc>, window_params = [{pipeline_mode = #tpu.pipeline_mode<synchronous>, transform_indices = @transform_0, window_bounds = array<i64: 8, 512>}, {pipeline_mode = #tpu.pipeline_mode<synchronous>, transform_indices = @transform_1, window_bounds = array<i64: 8, 1>}, {pipeline_mode = #tpu.pipeline_mode<synchronous>, transform_indices = @transform_2, window_bounds = array<i64: 8, 1>}, {pipeline_mode = #tpu.pipeline_mode<synchronous>, transform_indices = @transform_3, window_bounds = array<i64: 9, 1, 512>}, {pipeline_mode = #tpu.pipeline_mode<synchronous>, transform_indices = @transform_4, window_bounds = array<i64: 8, 72>}, {pipeline_mode = #tpu.pipeline_mode<synchronous>, transform_indices = @transform_5, window_bounds = array<i64: 8, 1>}, {pipeline_mode = #tpu.pipeline_mode<synchronous>, transform_indices = @transform_6, window_bounds = array<i64: 8, 72>}, {pipeline_mode = #tpu.pipeline_mode<synchronous>, transform_indices = @transform_7, window_bounds = array<i64: 8, 1>}, {}, {pipeline_mode = #tpu.pipeline_mode<synchronous>, transform_indices = @transform_9, window_bounds = array<i64: 1, 32>}, {pipeline_mode = #tpu.pipeline_mode<synchronous>, transform_indices = @transform_10, window_bounds = array<i64: 8, 512>}, {pipeline_mode = #tpu.pipeline_mode<synchronous>, transform_indices = @transform_11, window_bounds = array<i64: 8, 512>}, {pipeline_mode = #tpu.pipeline_mode<synchronous>, transform_indices = @transform_12, window_bounds = array<i64: 2, 32>}]} {
    %c0_i32 = arith.constant 0 : i32
    %0 = tpu.memref_slice %arg16[%c0_i32] : memref<1x!tpu.dma_semaphore, #tpu.memory_space<semaphore_mem>> -> memref<1x!tpu.dma_semaphore, #tpu.memory_space<semaphore_mem>>
    %1 = tpu.memref_squeeze %0 : memref<1x!tpu.dma_semaphore, #tpu.memory_space<semaphore_mem>> -> memref<!tpu.dma_semaphore, #tpu.memory_space<semaphore_mem>>
    tpu.enqueue_dma source(%arg9 : memref<2048x32xbf16, #tpu.memory_space<any>>) target(%arg15 : memref<2048x32xbf16, #tpu.memory_space<vmem>>) target_semaphore(%1 : memref<!tpu.dma_semaphore, #tpu.memory_space<semaphore_mem>>)
    %c0 = arith.constant 0 : index
    %c0_0 = arith.constant 0 : index
    %2 = vector.load %arg1[%c0, %c0_0] : memref<8x512xf32, #tpu.memory_space<vmem>>, vector<8x512xf32>
    %c0_1 = arith.constant 0 : index
    %c0_2 = arith.constant 0 : index
    %3 = vector.load %arg2[%c0_1, %c0_2] : memref<8x1xf32, #tpu.memory_space<vmem>>, vector<8x1xf32>
    %4 = vector.broadcast %3 : vector<8x1xf32> to vector<8x512xf32>
    %5 = arith.mulf %2, %4 : vector<8x512xf32>
    %c0_3 = arith.constant 0 : index
    %c0_4 = arith.constant 0 : index
    %6 = vector.load %arg3[%c0_3, %c0_4] : memref<8x1xf32, #tpu.memory_space<vmem>>, vector<8x1xf32>
    %7 = vector.broadcast %6 : vector<8x1xf32> to vector<8x512xf32>
    %8 = arith.addf %5, %7 : vector<8x512xf32>
    %c17_i32 = arith.constant 17 : i32
    %9 = tpu.dynamic_rotate %8 by %c17_i32 dim 1 : vector<8x512xf32>, i32 -> vector<8x512xf32>
    %c0_5 = arith.constant 0 : index
    %c0_6 = arith.constant 0 : index
    %c0_7 = arith.constant 0 : index
    %10 = vector.load %arg4[%c0_5, %c0_6, %c0_7] : memref<9x1x512xf32, #tpu.memory_space<vmem>>, vector<1x1x512xf32>
    %11 = vector.shape_cast %10 : vector<1x1x512xf32> to vector<1x512xf32>
    %12 = vector.broadcast %11 : vector<1x512xf32> to vector<8x512xf32>
    %13 = arith.mulf %9, %12 : vector<8x512xf32>
    %c0_8 = arith.constant 0 : index
    %c0_9 = arith.constant 0 : index
    %14 = vector.load %arg14[%c0_8, %c0_9] : memref<72x512xf32, #tpu.memory_space<vmem>>, vector<8x512xf32>
    tpu.vector_store %arg14[%c0_8, %c0_9], %13 {strides = array<i32>} : memref<72x512xf32, #tpu.memory_space<vmem>>, vector<8x512xf32>,
    %c16_i32 = arith.constant 16 : i32
    %15 = tpu.dynamic_rotate %8 by %c16_i32 dim 1 : vector<8x512xf32>, i32 -> vector<8x512xf32>
    %c1 = arith.constant 1 : index
    %c0_10 = arith.constant 0 : index
    %c0_11 = arith.constant 0 : index
    %16 = vector.load %arg4[%c1, %c0_10, %c0_11] : memref<9x1x512xf32, #tpu.memory_space<vmem>>, vector<1x1x512xf32>
    %17 = vector.shape_cast %16 : vector<1x1x512xf32> to vector<1x512xf32>
    %18 = vector.broadcast %17 : vector<1x512xf32> to vector<8x512xf32>
    %19 = arith.mulf %15, %18 : vector<8x512xf32>
    %c8 = arith.constant 8 : index
    %c0_12 = arith.constant 0 : index
    %20 = vector.load %arg14[%c8, %c0_12] : memref<72x512xf32, #tpu.memory_space<vmem>>, vector<8x512xf32>
    tpu.vector_store %arg14[%c8, %c0_12], %19 {strides = array<i32>} : memref<72x512xf32, #tpu.memory_space<vmem>>, vector<8x512xf32>,
    %c15_i32 = arith.constant 15 : i32
    %21 = tpu.dynamic_rotate %8 by %c15_i32 dim 1 : vector<8x512xf32>, i32 -> vector<8x512xf32>
    %c2 = arith.constant 2 : index
    %c0_13 = arith.constant 0 : index
    %c0_14 = arith.constant 0 : index
    %22 = vector.load %arg4[%c2, %c0_13, %c0_14] : memref<9x1x512xf32, #tpu.memory_space<vmem>>, vector<1x1x512xf32>
    %23 = vector.shape_cast %22 : vector<1x1x512xf32> to vector<1x512xf32>
    %24 = vector.broadcast %23 : vector<1x512xf32> to vector<8x512xf32>
    %25 = arith.mulf %21, %24 : vector<8x512xf32>
    %c16 = arith.constant 16 : index
    %c0_15 = arith.constant 0 : index
    %26 = vector.load %arg14[%c16, %c0_15] : memref<72x512xf32, #tpu.memory_space<vmem>>, vector<8x512xf32>
    tpu.vector_store %arg14[%c16, %c0_15], %25 {strides = array<i32>} : memref<72x512xf32, #tpu.memory_space<vmem>>, vector<8x512xf32>,
    %c1_i32 = arith.constant 1 : i32
    %27 = tpu.dynamic_rotate %8 by %c1_i32 dim 1 : vector<8x512xf32>, i32 -> vector<8x512xf32>
    %c3 = arith.constant 3 : index
    %c0_16 = arith.constant 0 : index
    %c0_17 = arith.constant 0 : index
    %28 = vector.load %arg4[%c3, %c0_16, %c0_17] : memref<9x1x512xf32, #tpu.memory_space<vmem>>, vector<1x1x512xf32>
    %29 = vector.shape_cast %28 : vector<1x1x512xf32> to vector<1x512xf32>
    %30 = vector.broadcast %29 : vector<1x512xf32> to vector<8x512xf32>
    %31 = arith.mulf %27, %30 : vector<8x512xf32>
    %c24 = arith.constant 24 : index
    %c0_18 = arith.constant 0 : index
    %32 = vector.load %arg14[%c24, %c0_18] : memref<72x512xf32, #tpu.memory_space<vmem>>, vector<8x512xf32>
    tpu.vector_store %arg14[%c24, %c0_18], %31 {strides = array<i32>} : memref<72x512xf32, #tpu.memory_space<vmem>>, vector<8x512xf32>,
    %c32 = arith.constant 32 : index
    %c0_19 = arith.constant 0 : index
    %33 = vector.load %arg14[%c32, %c0_19] : memref<72x512xf32, #tpu.memory_space<vmem>>, vector<8x512xf32>
    tpu.vector_store %arg14[%c32, %c0_19], %8 {strides = array<i32>} : memref<72x512xf32, #tpu.memory_space<vmem>>, vector<8x512xf32>,
    %c511_i32 = arith.constant 511 : i32
    %34 = tpu.dynamic_rotate %8 by %c511_i32 dim 1 : vector<8x512xf32>, i32 -> vector<8x512xf32>
    %c5 = arith.constant 5 : index
    %c0_20 = arith.constant 0 : index
    %c0_21 = arith.constant 0 : index
    %35 = vector.load %arg4[%c5, %c0_20, %c0_21] : memref<9x1x512xf32, #tpu.memory_space<vmem>>, vector<1x1x512xf32>
    %36 = vector.shape_cast %35 : vector<1x1x512xf32> to vector<1x512xf32>
    %37 = vector.broadcast %36 : vector<1x512xf32> to vector<8x512xf32>
    %38 = arith.mulf %34, %37 : vector<8x512xf32>
    %c40 = arith.constant 40 : index
    %c0_22 = arith.constant 0 : index
    %39 = vector.load %arg14[%c40, %c0_22] : memref<72x512xf32, #tpu.memory_space<vmem>>, vector<8x512xf32>
    tpu.vector_store %arg14[%c40, %c0_22], %38 {strides = array<i32>} : memref<72x512xf32, #tpu.memory_space<vmem>>, vector<8x512xf32>,
    %c497_i32 = arith.constant 497 : i32
    %40 = tpu.dynamic_rotate %8 by %c497_i32 dim 1 : vector<8x512xf32>, i32 -> vector<8x512xf32>
    %c6 = arith.constant 6 : index
    %c0_23 = arith.constant 0 : index
    %c0_24 = arith.constant 0 : index
    %41 = vector.load %arg4[%c6, %c0_23, %c0_24] : memref<9x1x512xf32, #tpu.memory_space<vmem>>, vector<1x1x512xf32>
    %42 = vector.shape_cast %41 : vector<1x1x512xf32> to vector<1x512xf32>
    %43 = vector.broadcast %42 : vector<1x512xf32> to vector<8x512xf32>
    %44 = arith.mulf %40, %43 : vector<8x512xf32>
    %c48 = arith.constant 48 : index
    %c0_25 = arith.constant 0 : index
    %45 = vector.load %arg14[%c48, %c0_25] : memref<72x512xf32, #tpu.memory_space<vmem>>, vector<8x512xf32>
    tpu.vector_store %arg14[%c48, %c0_25], %44 {strides = array<i32>} : memref<72x512xf32, #tpu.memory_space<vmem>>, vector<8x512xf32>,
    %c496_i32 = arith.constant 496 : i32
    %46 = tpu.dynamic_rotate %8 by %c496_i32 dim 1 : vector<8x512xf32>, i32 -> vector<8x512xf32>
    %c7 = arith.constant 7 : index
    %c0_26 = arith.constant 0 : index
    %c0_27 = arith.constant 0 : index
    %47 = vector.load %arg4[%c7, %c0_26, %c0_27] : memref<9x1x512xf32, #tpu.memory_space<vmem>>, vector<1x1x512xf32>
    %48 = vector.shape_cast %47 : vector<1x1x512xf32> to vector<1x512xf32>
    %49 = vector.broadcast %48 : vector<1x512xf32> to vector<8x512xf32>
    %50 = arith.mulf %46, %49 : vector<8x512xf32>
    %c56 = arith.constant 56 : index
    %c0_28 = arith.constant 0 : index
    %51 = vector.load %arg14[%c56, %c0_28] : memref<72x512xf32, #tpu.memory_space<vmem>>, vector<8x512xf32>
    tpu.vector_store %arg14[%c56, %c0_28], %50 {strides = array<i32>} : memref<72x512xf32, #tpu.memory_space<vmem>>, vector<8x512xf32>,
    %c495_i32 = arith.constant 495 : i32
    %52 = tpu.dynamic_rotate %8 by %c495_i32 dim 1 : vector<8x512xf32>, i32 -> vector<8x512xf32>
    %c8_29 = arith.constant 8 : index
    %c0_30 = arith.constant 0 : index
    %c0_31 = arith.constant 0 : index
    %53 = vector.load %arg4[%c8_29, %c0_30, %c0_31] : memref<9x1x512xf32, #tpu.memory_space<vmem>>, vector<1x1x512xf32>
    %54 = vector.shape_cast %53 : vector<1x1x512xf32> to vector<1x512xf32>
    %55 = vector.broadcast %54 : vector<1x512xf32> to vector<8x512xf32>
    %56 = arith.mulf %52, %55 : vector<8x512xf32>
    %c64 = arith.constant 64 : index
    %c0_32 = arith.constant 0 : index
    %57 = vector.load %arg14[%c64, %c0_32] : memref<72x512xf32, #tpu.memory_space<vmem>>, vector<8x512xf32>
    tpu.vector_store %arg14[%c64, %c0_32], %56 {strides = array<i32>} : memref<72x512xf32, #tpu.memory_space<vmem>>, vector<8x512xf32>,
    %c0_33 = arith.constant 0 : index
    %c0_34 = arith.constant 0 : index
    %58 = vector.load %arg5[%c0_33, %c0_34] : memref<8x72xf32, #tpu.memory_space<vmem>>, vector<8x72xf32>
    %c0_35 = arith.constant 0 : index
    %c0_36 = arith.constant 0 : index
    %59 = vector.load %arg14[%c0_35, %c0_36] : memref<72x512xf32, #tpu.memory_space<vmem>>, vector<72x512xf32>
    %cst = arith.constant dense<0.000000e+00> : vector<8x512xf32>
    %60 = tpu.matmul %58, %59, %cst {dimension_numbers = #tpu.dot_dimension_numbers<[1], [0], [0], [1], [0, 0, 1, 1], [], []>} : vector<8x72xf32>, vector<72x512xf32>, vector<8x512xf32> -> vector<8x512xf32>
    %c0_37 = arith.constant 0 : index
    %c0_38 = arith.constant 0 : index
    %61 = vector.load %arg6[%c0_37, %c0_38] : memref<8x1xf32, #tpu.memory_space<vmem>>, vector<8x1xf32>
    %62 = vector.broadcast %61 : vector<8x1xf32> to vector<8x512xf32>
    %63 = arith.addf %60, %62 : vector<8x512xf32>
    %64 = vector.extract_strided_slice %63 {offsets = [0, 0], sizes = [8, 256], strides = [1, 1]} : vector<8x512xf32> to vector<8x256xf32>
    %65 = tpu.concatenate %64, %64 in 1 : vector<8x256xf32>, vector<8x256xf32> -> vector<8x512xf32>
    %66 = arith.mulf %65, %63 : vector<8x512xf32>
    %cst_39 = arith.constant 0.000000e+00 : f32
    %67 = vector.broadcast %cst_39 : f32 to vector<8x512xf32>
    %68 = arith.cmpf ogt, %66, %67 : vector<8x512xf32>
    %69 = arith.extui %68 : vector<8x512xi1> to vector<8x512xi32>
    %70 = arith.sitofp %69 : vector<8x512xi32> to vector<8x512xf32>
    %71 = arith.truncf %70 : vector<8x512xf32> to vector<8x512xbf16>
    %c0_40 = arith.constant 0 : index
    %c0_41 = arith.constant 0 : index
    %72 = vector.load %arg11[%c0_40, %c0_41] : memref<8x512xbf16, #tpu.memory_space<vmem>>, vector<8x512xbf16>
    tpu.vector_store %arg11[%c0_40, %c0_41], %71 {strides = array<i32>} : memref<8x512xbf16, #tpu.memory_space<vmem>>, vector<8x512xbf16>,
    %cst_42 = arith.constant 0.000000e+00 : f32
    %73 = vector.broadcast %cst_42 : f32 to vector<8x512xf32>
    %74 = arith.maximumf %63, %73 : vector<8x512xf32>
    %c17_i32_43 = arith.constant 17 : i32
    %75 = tpu.dynamic_rotate %74 by %c17_i32_43 dim 1 : vector<8x512xf32>, i32 -> vector<8x512xf32>
    %c0_44 = arith.constant 0 : index
    %c0_45 = arith.constant 0 : index
    %c0_46 = arith.constant 0 : index
    %76 = vector.load %arg4[%c0_44, %c0_45, %c0_46] : memref<9x1x512xf32, #tpu.memory_space<vmem>>, vector<1x1x512xf32>
    %77 = vector.shape_cast %76 : vector<1x1x512xf32> to vector<1x512xf32>
    %78 = vector.broadcast %77 : vector<1x512xf32> to vector<8x512xf32>
    %79 = arith.mulf %75, %78 : vector<8x512xf32>
    %c0_47 = arith.constant 0 : index
    %c0_48 = arith.constant 0 : index
    %80 = vector.load %arg14[%c0_47, %c0_48] : memref<72x512xf32, #tpu.memory_space<vmem>>, vector<8x512xf32>
    tpu.vector_store %arg14[%c0_47, %c0_48], %79 {strides = array<i32>} : memref<72x512xf32, #tpu.memory_space<vmem>>, vector<8x512xf32>,
    %c16_i32_49 = arith.constant 16 : i32
    %81 = tpu.dynamic_rotate %74 by %c16_i32_49 dim 1 : vector<8x512xf32>, i32 -> vector<8x512xf32>
    %c1_50 = arith.constant 1 : index
    %c0_51 = arith.constant 0 : index
    %c0_52 = arith.constant 0 : index
    %82 = vector.load %arg4[%c1_50, %c0_51, %c0_52] : memref<9x1x512xf32, #tpu.memory_space<vmem>>, vector<1x1x512xf32>
    %83 = vector.shape_cast %82 : vector<1x1x512xf32> to vector<1x512xf32>
    %84 = vector.broadcast %83 : vector<1x512xf32> to vector<8x512xf32>
    %85 = arith.mulf %81, %84 : vector<8x512xf32>
    %c8_53 = arith.constant 8 : index
    %c0_54 = arith.constant 0 : index
    %86 = vector.load %arg14[%c8_53, %c0_54] : memref<72x512xf32, #tpu.memory_space<vmem>>, vector<8x512xf32>
    tpu.vector_store %arg14[%c8_53, %c0_54], %85 {strides = array<i32>} : memref<72x512xf32, #tpu.memory_space<vmem>>, vector<8x512xf32>,
    %c15_i32_55 = arith.constant 15 : i32
    %87 = tpu.dynamic_rotate %74 by %c15_i32_55 dim 1 : vector<8x512xf32>, i32 -> vector<8x512xf32>
    %c2_56 = arith.constant 2 : index
    %c0_57 = arith.constant 0 : index
    %c0_58 = arith.constant 0 : index
    %88 = vector.load %arg4[%c2_56, %c0_57, %c0_58] : memref<9x1x512xf32, #tpu.memory_space<vmem>>, vector<1x1x512xf32>
    %89 = vector.shape_cast %88 : vector<1x1x512xf32> to vector<1x512xf32>
    %90 = vector.broadcast %89 : vector<1x512xf32> to vector<8x512xf32>
    %91 = arith.mulf %87, %90 : vector<8x512xf32>
    %c16_59 = arith.constant 16 : index
    %c0_60 = arith.constant 0 : index
    %92 = vector.load %arg14[%c16_59, %c0_60] : memref<72x512xf32, #tpu.memory_space<vmem>>, vector<8x512xf32>
    tpu.vector_store %arg14[%c16_59, %c0_60], %91 {strides = array<i32>} : memref<72x512xf32, #tpu.memory_space<vmem>>, vector<8x512xf32>,
    %c1_i32_61 = arith.constant 1 : i32
    %93 = tpu.dynamic_rotate %74 by %c1_i32_61 dim 1 : vector<8x512xf32>, i32 -> vector<8x512xf32>
    %c3_62 = arith.constant 3 : index
    %c0_63 = arith.constant 0 : index
    %c0_64 = arith.constant 0 : index
    %94 = vector.load %arg4[%c3_62, %c0_63, %c0_64] : memref<9x1x512xf32, #tpu.memory_space<vmem>>, vector<1x1x512xf32>
    %95 = vector.shape_cast %94 : vector<1x1x512xf32> to vector<1x512xf32>
    %96 = vector.broadcast %95 : vector<1x512xf32> to vector<8x512xf32>
    %97 = arith.mulf %93, %96 : vector<8x512xf32>
    %c24_65 = arith.constant 24 : index
    %c0_66 = arith.constant 0 : index
    %98 = vector.load %arg14[%c24_65, %c0_66] : memref<72x512xf32, #tpu.memory_space<vmem>>, vector<8x512xf32>
    tpu.vector_store %arg14[%c24_65, %c0_66], %97 {strides = array<i32>} : memref<72x512xf32, #tpu.memory_space<vmem>>, vector<8x512xf32>,
    %c32_67 = arith.constant 32 : index
    %c0_68 = arith.constant 0 : index
    %99 = vector.load %arg14[%c32_67, %c0_68] : memref<72x512xf32, #tpu.memory_space<vmem>>, vector<8x512xf32>
    tpu.vector_store %arg14[%c32_67, %c0_68], %74 {strides = array<i32>} : memref<72x512xf32, #tpu.memory_space<vmem>>, vector<8x512xf32>,
    %c511_i32_69 = arith.constant 511 : i32
    %100 = tpu.dynamic_rotate %74 by %c511_i32_69 dim 1 : vector<8x512xf32>, i32 -> vector<8x512xf32>
    %c5_70 = arith.constant 5 : index
    %c0_71 = arith.constant 0 : index
    %c0_72 = arith.constant 0 : index
    %101 = vector.load %arg4[%c5_70, %c0_71, %c0_72] : memref<9x1x512xf32, #tpu.memory_space<vmem>>, vector<1x1x512xf32>
    %102 = vector.shape_cast %101 : vector<1x1x512xf32> to vector<1x512xf32>
    %103 = vector.broadcast %102 : vector<1x512xf32> to vector<8x512xf32>
    %104 = arith.mulf %100, %103 : vector<8x512xf32>
    %c40_73 = arith.constant 40 : index
    %c0_74 = arith.constant 0 : index
    %105 = vector.load %arg14[%c40_73, %c0_74] : memref<72x512xf32, #tpu.memory_space<vmem>>, vector<8x512xf32>
    tpu.vector_store %arg14[%c40_73, %c0_74], %104 {strides = array<i32>} : memref<72x512xf32, #tpu.memory_space<vmem>>, vector<8x512xf32>,
    %c497_i32_75 = arith.constant 497 : i32
    %106 = tpu.dynamic_rotate %74 by %c497_i32_75 dim 1 : vector<8x512xf32>, i32 -> vector<8x512xf32>
    %c6_76 = arith.constant 6 : index
    %c0_77 = arith.constant 0 : index
    %c0_78 = arith.constant 0 : index
    %107 = vector.load %arg4[%c6_76, %c0_77, %c0_78] : memref<9x1x512xf32, #tpu.memory_space<vmem>>, vector<1x1x512xf32>
    %108 = vector.shape_cast %107 : vector<1x1x512xf32> to vector<1x512xf32>
    %109 = vector.broadcast %108 : vector<1x512xf32> to vector<8x512xf32>
    %110 = arith.mulf %106, %109 : vector<8x512xf32>
    %c48_79 = arith.constant 48 : index
    %c0_80 = arith.constant 0 : index
    %111 = vector.load %arg14[%c48_79, %c0_80] : memref<72x512xf32, #tpu.memory_space<vmem>>, vector<8x512xf32>
    tpu.vector_store %arg14[%c48_79, %c0_80], %110 {strides = array<i32>} : memref<72x512xf32, #tpu.memory_space<vmem>>, vector<8x512xf32>,
    %c496_i32_81 = arith.constant 496 : i32
    %112 = tpu.dynamic_rotate %74 by %c496_i32_81 dim 1 : vector<8x512xf32>, i32 -> vector<8x512xf32>
    %c7_82 = arith.constant 7 : index
    %c0_83 = arith.constant 0 : index
    %c0_84 = arith.constant 0 : index
    %113 = vector.load %arg4[%c7_82, %c0_83, %c0_84] : memref<9x1x512xf32, #tpu.memory_space<vmem>>, vector<1x1x512xf32>
    %114 = vector.shape_cast %113 : vector<1x1x512xf32> to vector<1x512xf32>
    %115 = vector.broadcast %114 : vector<1x512xf32> to vector<8x512xf32>
    %116 = arith.mulf %112, %115 : vector<8x512xf32>
    %c56_85 = arith.constant 56 : index
    %c0_86 = arith.constant 0 : index
    %117 = vector.load %arg14[%c56_85, %c0_86] : memref<72x512xf32, #tpu.memory_space<vmem>>, vector<8x512xf32>
    tpu.vector_store %arg14[%c56_85, %c0_86], %116 {strides = array<i32>} : memref<72x512xf32, #tpu.memory_space<vmem>>, vector<8x512xf32>,
    %c495_i32_87 = arith.constant 495 : i32
    %118 = tpu.dynamic_rotate %74 by %c495_i32_87 dim 1 : vector<8x512xf32>, i32 -> vector<8x512xf32>
    %c8_88 = arith.constant 8 : index
    %c0_89 = arith.constant 0 : index
    %c0_90 = arith.constant 0 : index
    %119 = vector.load %arg4[%c8_88, %c0_89, %c0_90] : memref<9x1x512xf32, #tpu.memory_space<vmem>>, vector<1x1x512xf32>
    %120 = vector.shape_cast %119 : vector<1x1x512xf32> to vector<1x512xf32>
    %121 = vector.broadcast %120 : vector<1x512xf32> to vector<8x512xf32>
    %122 = arith.mulf %118, %121 : vector<8x512xf32>
    %c64_91 = arith.constant 64 : index
    %c0_92 = arith.constant 0 : index
    %123 = vector.load %arg14[%c64_91, %c0_92] : memref<72x512xf32, #tpu.memory_space<vmem>>, vector<8x512xf32>
    tpu.vector_store %arg14[%c64_91, %c0_92], %122 {strides = array<i32>} : memref<72x512xf32, #tpu.memory_space<vmem>>, vector<8x512xf32>,
    %c0_93 = arith.constant 0 : index
    %c0_94 = arith.constant 0 : index
    %124 = vector.load %arg7[%c0_93, %c0_94] : memref<8x72xf32, #tpu.memory_space<vmem>>, vector<8x72xf32>
    %c0_95 = arith.constant 0 : index
    %c0_96 = arith.constant 0 : index
    %125 = vector.load %arg14[%c0_95, %c0_96] : memref<72x512xf32, #tpu.memory_space<vmem>>, vector<72x512xf32>
    %cst_97 = arith.constant dense<0.000000e+00> : vector<8x512xf32>
    %126 = tpu.matmul %124, %125, %cst_97 {dimension_numbers = #tpu.dot_dimension_numbers<[1], [0], [0], [1], [0, 0, 1, 1], [], []>} : vector<8x72xf32>, vector<72x512xf32>, vector<8x512xf32> -> vector<8x512xf32>
    %c0_98 = arith.constant 0 : index
    %c0_99 = arith.constant 0 : index
    %127 = vector.load %arg8[%c0_98, %c0_99] : memref<8x1xf32, #tpu.memory_space<vmem>>, vector<8x1xf32>
    %128 = vector.broadcast %127 : vector<8x1xf32> to vector<8x512xf32>
    %129 = arith.addf %126, %128 : vector<8x512xf32>
    %130 = vector.extract_strided_slice %129 {offsets = [0, 0], sizes = [8, 256], strides = [1, 1]} : vector<8x512xf32> to vector<8x256xf32>
    %131 = tpu.concatenate %130, %130 in 1 : vector<8x256xf32>, vector<8x256xf32> -> vector<8x512xf32>
    %132 = arith.mulf %131, %129 : vector<8x512xf32>
    %cst_100 = arith.constant 0.000000e+00 : f32
    %133 = vector.broadcast %cst_100 : f32 to vector<8x512xf32>
    %134 = arith.cmpf ogt, %132, %133 : vector<8x512xf32>
    %135 = arith.extui %134 : vector<8x512xi1> to vector<8x512xi32>
    %136 = arith.sitofp %135 : vector<8x512xi32> to vector<8x512xf32>
    %137 = arith.truncf %136 : vector<8x512xf32> to vector<8x512xbf16>
    %c0_101 = arith.constant 0 : index
    %c0_102 = arith.constant 0 : index
    %138 = vector.load %arg12[%c0_101, %c0_102] : memref<8x512xbf16, #tpu.memory_space<vmem>>, vector<8x512xbf16>
    tpu.vector_store %arg12[%c0_101, %c0_102], %137 {strides = array<i32>} : memref<8x512xbf16, #tpu.memory_space<vmem>>, vector<8x512xbf16>,
    %cst_103 = arith.constant 0.000000e+00 : f32
    %139 = vector.broadcast %cst_103 : f32 to vector<8x512xf32>
    %140 = arith.maximumf %129, %139 : vector<8x512xf32>
    %141 = vector.extract_strided_slice %140 {offsets = [0, 0], sizes = [1, 256], strides = [1, 1]} : vector<8x512xf32> to vector<1x256xf32>
    %142 = vector.extract_strided_slice %140 {offsets = [1, 0], sizes = [1, 256], strides = [1, 1]} : vector<8x512xf32> to vector<1x256xf32>
    %143 = vector.extract_strided_slice %140 {offsets = [2, 0], sizes = [1, 256], strides = [1, 1]} : vector<8x512xf32> to vector<1x256xf32>
    %144 = vector.extract_strided_slice %140 {offsets = [3, 0], sizes = [1, 256], strides = [1, 1]} : vector<8x512xf32> to vector<1x256xf32>
    %145 = vector.extract_strided_slice %140 {offsets = [4, 0], sizes = [1, 256], strides = [1, 1]} : vector<8x512xf32> to vector<1x256xf32>
    %146 = vector.extract_strided_slice %140 {offsets = [5, 0], sizes = [1, 256], strides = [1, 1]} : vector<8x512xf32> to vector<1x256xf32>
    %147 = vector.extract_strided_slice %140 {offsets = [6, 0], sizes = [1, 256], strides = [1, 1]} : vector<8x512xf32> to vector<1x256xf32>
    %148 = vector.extract_strided_slice %140 {offsets = [7, 0], sizes = [1, 256], strides = [1, 1]} : vector<8x512xf32> to vector<1x256xf32>
    %149 = tpu.concatenate %141, %142, %143, %144, %145, %146, %147, %148 in 1 : vector<1x256xf32>, vector<1x256xf32>, vector<1x256xf32>, vector<1x256xf32>, vector<1x256xf32>, vector<1x256xf32>, vector<1x256xf32>, vector<1x256xf32> -> vector<1x2048xf32>
    %150 = vector.extract_strided_slice %140 {offsets = [0, 256], sizes = [1, 256], strides = [1, 1]} : vector<8x512xf32> to vector<1x256xf32>
    %151 = vector.extract_strided_slice %140 {offsets = [1, 256], sizes = [1, 256], strides = [1, 1]} : vector<8x512xf32> to vector<1x256xf32>
    %152 = vector.extract_strided_slice %140 {offsets = [2, 256], sizes = [1, 256], strides = [1, 1]} : vector<8x512xf32> to vector<1x256xf32>
    %153 = vector.extract_strided_slice %140 {offsets = [3, 256], sizes = [1, 256], strides = [1, 1]} : vector<8x512xf32> to vector<1x256xf32>
    %154 = vector.extract_strided_slice %140 {offsets = [4, 256], sizes = [1, 256], strides = [1, 1]} : vector<8x512xf32> to vector<1x256xf32>
    %155 = vector.extract_strided_slice %140 {offsets = [5, 256], sizes = [1, 256], strides = [1, 1]} : vector<8x512xf32> to vector<1x256xf32>
    %156 = vector.extract_strided_slice %140 {offsets = [6, 256], sizes = [1, 256], strides = [1, 1]} : vector<8x512xf32> to vector<1x256xf32>
    %157 = vector.extract_strided_slice %140 {offsets = [7, 256], sizes = [1, 256], strides = [1, 1]} : vector<8x512xf32> to vector<1x256xf32>
    %158 = tpu.concatenate %150, %151, %152, %153, %154, %155, %156, %157 in 1 : vector<1x256xf32>, vector<1x256xf32>, vector<1x256xf32>, vector<1x256xf32>, vector<1x256xf32>, vector<1x256xf32>, vector<1x256xf32>, vector<1x256xf32> -> vector<1x2048xf32>
    %159 = tpu.concatenate %149, %158 in 0 : vector<1x2048xf32>, vector<1x2048xf32> -> vector<2x2048xf32>
    %c0_i32_104 = arith.constant 0 : i32
    %160 = tpu.memref_slice %arg16[%c0_i32_104] : memref<1x!tpu.dma_semaphore, #tpu.memory_space<semaphore_mem>> -> memref<1x!tpu.dma_semaphore, #tpu.memory_space<semaphore_mem>>
    %161 = tpu.memref_squeeze %160 : memref<1x!tpu.dma_semaphore, #tpu.memory_space<semaphore_mem>> -> memref<!tpu.dma_semaphore, #tpu.memory_space<semaphore_mem>>
    tpu.wait_dma2 semaphore(%161 : memref<!tpu.dma_semaphore, #tpu.memory_space<semaphore_mem>>) src(%arg9 : memref<2048x32xbf16, #tpu.memory_space<any>>) dst(%arg15 : memref<2048x32xbf16, #tpu.memory_space<vmem>>)
    %162 = arith.truncf %159 : vector<2x2048xf32> to vector<2x2048xbf16>
    %c0_105 = arith.constant 0 : index
    %c0_106 = arith.constant 0 : index
    %163 = vector.load %arg15[%c0_105, %c0_106] : memref<2048x32xbf16, #tpu.memory_space<vmem>>, vector<2048x32xbf16>
    %cst_107 = arith.constant dense<0.000000e+00> : vector<2x32xf32>
    %164 = tpu.matmul %162, %163, %cst_107 {dimension_numbers = #tpu.dot_dimension_numbers<[1], [0], [0], [1], [0, 0, 1, 1], [], []>} : vector<2x2048xbf16>, vector<2048x32xbf16>, vector<2x32xf32> -> vector<2x32xf32>
    %c0_108 = arith.constant 0 : index
    %c0_109 = arith.constant 0 : index
    %165 = vector.load %arg10[%c0_108, %c0_109] : memref<1x32xf32, #tpu.memory_space<vmem>>, vector<1x32xf32>
    %166 = vector.broadcast %165 : vector<1x32xf32> to vector<2x32xf32>
    %167 = arith.addf %164, %166 : vector<2x32xf32>
    %168 = vector.extract_strided_slice %167 {offsets = [0, 0], sizes = [1, 32], strides = [1, 1]} : vector<2x32xf32> to vector<1x32xf32>
    %169 = vector.broadcast %168 : vector<1x32xf32> to vector<2x32xf32>
    %170 = arith.mulf %169, %167 : vector<2x32xf32>
    %cst_110 = arith.constant 0.000000e+00 : f32
    %171 = vector.broadcast %cst_110 : f32 to vector<2x32xf32>
    %172 = arith.cmpf ogt, %170, %171 : vector<2x32xf32>
    %173 = arith.extui %172 : vector<2x32xi1> to vector<2x32xi32>
    %174 = arith.sitofp %173 : vector<2x32xi32> to vector<2x32xf32>
    %175 = arith.truncf %174 : vector<2x32xf32> to vector<2x32xbf16>
    %c0_111 = arith.constant 0 : index
    %c0_112 = arith.constant 0 : index
    %176 = vector.load %arg13[%c0_111, %c0_112] : memref<2x32xbf16, #tpu.memory_space<vmem>>, vector<2x32xbf16>
    tpu.vector_store %arg13[%c0_111, %c0_112], %175 {strides = array<i32>} : memref<2x32xbf16, #tpu.memory_space<vmem>>, vector<2x32xbf16>,
    return
  }
  func.func @transform_0(%arg0: i32) -> (i32, i32) {
    %c0_i32 = arith.constant 0 : i32
    %c0_i32_0 = arith.constant 0 : i32
    %c0_i32_1 = arith.constant 0 : i32
    return %c0_i32, %c0_i32_0 : i32, i32
  }
  func.func @transform_1(%arg0: i32) -> (i32, i32) {
    %c0_i32 = arith.constant 0 : i32
    %c0_i32_0 = arith.constant 0 : i32
    %c0_i32_1 = arith.constant 0 : i32
    return %c0_i32, %c0_i32_0 : i32, i32
  }
  func.func @transform_2(%arg0: i32) -> (i32, i32) {
    %c0_i32 = arith.constant 0 : i32
    %c0_i32_0 = arith.constant 0 : i32
    %c0_i32_1 = arith.constant 0 : i32
    return %c0_i32, %c0_i32_0 : i32, i32
  }
  func.func @transform_3(%arg0: i32) -> (i32, i32, i32) {
    %c0_i32 = arith.constant 0 : i32
    %c0_i32_0 = arith.constant 0 : i32
    %c0_i32_1 = arith.constant 0 : i32
    %c0_i32_2 = arith.constant 0 : i32
    return %c0_i32, %c0_i32_0, %c0_i32_1 : i32, i32, i32
  }
  func.func @transform_4(%arg0: i32) -> (i32, i32) {
    %c0_i32 = arith.constant 0 : i32
    %c0_i32_0 = arith.constant 0 : i32
    %c0_i32_1 = arith.constant 0 : i32
    return %c0_i32, %c0_i32_0 : i32, i32
  }
  func.func @transform_5(%arg0: i32) -> (i32, i32) {
    %c0_i32 = arith.constant 0 : i32
    %c0_i32_0 = arith.constant 0 : i32
    %c0_i32_1 = arith.constant 0 : i32
    return %c0_i32, %c0_i32_0 : i32, i32
  }
  func.func @transform_6(%arg0: i32) -> (i32, i32) {
    %c0_i32 = arith.constant 0 : i32
    %c0_i32_0 = arith.constant 0 : i32
    %c0_i32_1 = arith.constant 0 : i32
    return %c0_i32, %c0_i32_0 : i32, i32
  }
  func.func @transform_7(%arg0: i32) -> (i32, i32) {
    %c0_i32 = arith.constant 0 : i32
    %c0_i32_0 = arith.constant 0 : i32
    %c0_i32_1 = arith.constant 0 : i32
    return %c0_i32, %c0_i32_0 : i32, i32
  }
  func.func @transform_9(%arg0: i32) -> (i32, i32) {
    %c0_i32 = arith.constant 0 : i32
    %c0_i32_0 = arith.constant 0 : i32
    %c0_i32_1 = arith.constant 0 : i32
    return %c0_i32, %c0_i32_0 : i32, i32
  }
  func.func @transform_10(%arg0: i32) -> (i32, i32) {
    %c0_i32 = arith.constant 0 : i32
    %c0_i32_0 = arith.constant 0 : i32
    %c0_i32_1 = arith.constant 0 : i32
    return %c0_i32, %c0_i32_0 : i32, i32
  }
  func.func @transform_11(%arg0: i32) -> (i32, i32) {
    %c0_i32 = arith.constant 0 : i32
    %c0_i32_0 = arith.constant 0 : i32
    %c0_i32_1 = arith.constant 0 : i32
    return %c0_i32, %c0_i32_0 : i32, i32
  }
  func.func @transform_12(%arg0: i32) -> (i32, i32) {
    %c0_i32 = arith.constant 0 : i32
    %c0_i32_0 = arith.constant 0 : i32
    %c0_i32_1 = arith.constant 0 : i32
    return %c0_i32, %c0_i32_0 : i32, i32
  }
}

</mosaic_0001>

<bundles_post_ra>
// kernel: dualnet_compute_fixed.1
= control target key start
LH: loop header
LB: loop body
LE: loop exit
PB: predicated region body
PF: predicated region fallthrough
CT: control target
= control target key end

     0   :  { %18 = vsyncpa [#allocation6], 0  ;;  %s4370_s0 = inlined_call_operand.vmem [shape: f32[8,512], index: 0, kind: input, shape index: {}]   ;;  %s4371_s1 = inlined_call_operand.vmem [shape: f32[8,1], index: 1, kind: input, shape index: {}]   ;;  %s4372_s2 = inlined_call_operand.vmem [shape: f32[8,1], index: 2, kind: input, shape index: {}]   ;;  %s4373_s3 = inlined_call_operand.vmem [shape: f32[9,1,512], index: 3, kind: input, shape index: {}]   ;;  %s4374_s4 = inlined_call_operand.vmem [shape: f32[8,72], index: 4, kind: input, shape index: {}]   ;;  %s4375_s5 = inlined_call_operand.vmem [shape: f32[8,1], index: 5, kind: input, shape index: {}]   ;;  %s4376_s6 = inlined_call_operand.vmem [shape: f32[8,72], index: 6, kind: input, shape index: {}]   ;;  %s4377_s7 = inlined_call_operand.vmem [shape: f32[8,1], index: 7, kind: input, shape index: {}]   ;;  %s4378_s8 = inlined_call_operand.vmem [shape: bf16[2048,32], index: 8, kind: input, shape index: {}]   ;;  %s4379_s9 = inlined_call_operand.vmem [shape: f32[1,32], index: 9, kind: input, shape index: {}]   ;;  %s4380_s10 = inlined_call_operand.hbm [shape: bf16[8,512], index: 10, kind: output, shape index: {0}]   ;;  %s4381_s11 = inlined_call_operand.hbm [shape: bf16[8,512], index: 11, kind: output, shape index: {1}]   ;;  %s4382_s12 = inlined_call_operand.hbm [shape: bf16[2,32], index: 12, kind: output, shape index: {2}]  }
   0x1   :  { %19 = vsyncpa [#allocation8], 0  ;;  %v48_v0 = vld [vmem:[%s4378_s8] sm:$0xff]  ;;  %v50_v1 = vld [vmem:[%s4378_s8 + $0x8] sm:$0xff] }
   0x2   :  { %49 = vst [vmem:[#allocation3 + $0x2b0] sm:$0xff] %v48_v0  ;;  %v52_v2 = vld [vmem:[%s4378_s8 + $0x10] sm:$0xff]  ;;  %v54_v3 = vld [vmem:[%s4378_s8 + $0x18] sm:$0xff]  ;;  %v56_v4 = vld [vmem:[%s4378_s8 + $0x20] sm:$0xff] }
   0x3   :  { %51 = vst [vmem:[#allocation3 + $0x3b0] sm:$0xff] %v50_v1  ;;  %v58_v5 = vld [vmem:[%s4378_s8 + $0x28] sm:$0xff]  ;;  %v60_v6 = vld [vmem:[%s4378_s8 + $0x30] sm:$0xff]  ;;  %v62_v7 = vld [vmem:[%s4378_s8 + $0x38] sm:$0xff] }
   0x4   :  { %53 = vst [vmem:[#allocation3 + $0xd8] sm:$0xff] %v52_v2  ;;  %v64_v8 = vld [vmem:[%s4378_s8 + $0x40] sm:$0xff]  ;;  %v66_v9 = vld [vmem:[%s4378_s8 + $0x48] sm:$0xff]  ;;  %v68_v10 = vld [vmem:[%s4378_s8 + $0x50] sm:$0xff] }
   0x5   :  { %55 = vst [vmem:[#allocation3 + $0x18] sm:$0xff] %v54_v3  ;;  %v70_v11 = vld [vmem:[%s4378_s8 + $0x58] sm:$0xff]  ;;  %v72_v12 = vld [vmem:[%s4378_s8 + $0x60] sm:$0xff]  ;;  %v74_v13 = vld [vmem:[%s4378_s8 + $0x68] sm:$0xff] }
   0x6   :  { %57 = vst [vmem:[#allocation3 + $0x50] sm:$0xff] %v56_v4  ;;  %v76_v14 = vld [vmem:[%s4378_s8 + $0x70] sm:$0xff]  ;;  %v78_v15 = vld [vmem:[%s4378_s8 + $0x78] sm:$0xff]  ;;  %v80_v16 = vld [vmem:[%s4378_s8 + $0x80] sm:$0xff] }
   0x7   :  { %59 = vst [vmem:[#allocation3 + $0x368] sm:$0xff] %v58_v5  ;;  %v82_v17 = vld [vmem:[%s4378_s8 + $0x88] sm:$0xff]  ;;  %v84_v18 = vld [vmem:[%s4378_s8 + $0x90] sm:$0xff]  ;;  %v86_v19 = vld [vmem:[%s4378_s8 + $0x98] sm:$0xff] }
   0x8   :  { %61 = vst [vmem:[#allocation3 + $0x330] sm:$0xff] %v60_v6  ;;  %v88_v20 = vld [vmem:[%s4378_s8 + $0xa0] sm:$0xff]  ;;  %v90_v21 = vld [vmem:[%s4378_s8 + $0xa8] sm:$0xff]  ;;  %v92_v22 = vld [vmem:[%s4378_s8 + $0xb0] sm:$0xff] }
   0x9   :  { %63 = vst [vmem:[#allocation3 + $0x48] sm:$0xff] %v62_v7  ;;  %v94_v23 = vld [vmem:[%s4378_s8 + $0xb8] sm:$0xff]  ;;  %v96_v24 = vld [vmem:[%s4378_s8 + $0xc0] sm:$0xff]  ;;  %v98_v25 = vld [vmem:[%s4378_s8 + $0xc8] sm:$0xff] }
   0xa   :  { %65 = vst [vmem:[#allocation3 + $0x380] sm:$0xff] %v64_v8  ;;  %v100_v26 = vld [vmem:[%s4378_s8 + $0xd0] sm:$0xff]  ;;  %v102_v27 = vld [vmem:[%s4378_s8 + $0xd8] sm:$0xff]  ;;  %v104_v28 = vld [vmem:[%s4378_s8 + $0xe0] sm:$0xff] }
   0xb   :  { %67 = vst [vmem:[#allocation3 + $0x110] sm:$0xff] %v66_v9  ;;  %v106_v29 = vld [vmem:[%s4378_s8 + $0xe8] sm:$0xff]  ;;  %v108_v30 = vld [vmem:[%s4378_s8 + $0xf0] sm:$0xff]  ;;  %v110_v31 = vld [vmem:[%s4378_s8 + $0xf8] sm:$0xff] }
   0xc   :  { %69 = vst [vmem:[#allocation3 + $0x118] sm:$0xff] %v68_v10  ;;  %v112_v32 = vld [vmem:[%s4378_s8 + $0x100] sm:$0xff]  ;;  %v114_v33 = vld [vmem:[%s4378_s8 + $0x108] sm:$0xff]  ;;  %v116_v34 = vld [vmem:[%s4378_s8 + $0x110] sm:$0xff] }
   0xd   :  { %71 = vst [vmem:[#allocation3 + $0x98] sm:$0xff] %v70_v11  ;;  %v118_v35 = vld [vmem:[%s4378_s8 + $0x118] sm:$0xff]  ;;  %v120_v36 = vld [vmem:[%s4378_s8 + $0x120] sm:$0xff]  ;;  %v122_v37 = vld [vmem:[%s4378_s8 + $0x128] sm:$0xff] }
   0xe   :  { %73 = vst [vmem:[#allocation3 + $0x320] sm:$0xff] %v72_v12  ;;  %v124_v38 = vld [vmem:[%s4378_s8 + $0x130] sm:$0xff]  ;;  %v126_v39 = vld [vmem:[%s4378_s8 + $0x138] sm:$0xff]  ;;  %v128_v40 = vld [vmem:[%s4378_s8 + $0x140] sm:$0xff] }
   0xf   :  { %75 = vst [vmem:[#allocation3 + $0x150] sm:$0xff] %v74_v13  ;;  %v130_v41 = vld [vmem:[%s4378_s8 + $0x148] sm:$0xff]  ;;  %v132_v42 = vld [vmem:[%s4378_s8 + $0x150] sm:$0xff]  ;;  %v134_v43 = vld [vmem:[%s4378_s8 + $0x158] sm:$0xff] }
  0x10   :  { %77 = vst [vmem:[#allocation3 + $0x108] sm:$0xff] %v76_v14  ;;  %v136_v44 = vld [vmem:[%s4378_s8 + $0x160] sm:$0xff]  ;;  %v138_v45 = vld [vmem:[%s4378_s8 + $0x168] sm:$0xff]  ;;  %v140_v46 = vld [vmem:[%s4378_s8 + $0x170] sm:$0xff] }
  0x11   :  { %79 = vst [vmem:[#allocation3 + $0x60] sm:$0xff] %v78_v15  ;;  %v142_v47 = vld [vmem:[%s4378_s8 + $0x178] sm:$0xff]  ;;  %v144_v48 = vld [vmem:[%s4378_s8 + $0x180] sm:$0xff]  ;;  %v146_v49 = vld [vmem:[%s4378_s8 + $0x188] sm:$0xff] }
  0x12   :  { %81 = vst [vmem:[#allocation3 + $0x2e0] sm:$0xff] %v80_v16  ;;  %v148_v50 = vld [vmem:[%s4378_s8 + $0x190] sm:$0xff]  ;;  %v150_v51 = vld [vmem:[%s4378_s8 + $0x198] sm:$0xff]  ;;  %v152_v52 = vld [vmem:[%s4378_s8 + $0x1a0] sm:$0xff] }
  0x13   :  { %83 = vst [vmem:[#allocation3 + $0x388] sm:$0xff] %v82_v17  ;;  %v154_v53 = vld [vmem:[%s4378_s8 + $0x1a8] sm:$0xff]  ;;  %v156_v54 = vld [vmem:[%s4378_s8 + $0x1b0] sm:$0xff]  ;;  %v158_v55 = vld [vmem:[%s4378_s8 + $0x1b8] sm:$0xff] }
  0x14   :  { %85 = vst [vmem:[#allocation3 + $0x338] sm:$0xff] %v84_v18  ;;  %v160_v56 = vld [vmem:[%s4378_s8 + $0x1c0] sm:$0xff]  ;;  %v162_v57 = vld [vmem:[%s4378_s8 + $0x1c8] sm:$0xff]  ;;  %v164_v58 = vld [vmem:[%s4378_s8 + $0x1d0] sm:$0xff] }
  0x15   :  { %87 = vst [vmem:[#allocation3 + $0x340] sm:$0xff] %v86_v19  ;;  %v166_v59 = vld [vmem:[%s4378_s8 + $0x1d8] sm:$0xff]  ;;  %v168_v60 = vld [vmem:[%s4378_s8 + $0x1e0] sm:$0xff]  ;;  %v170_v61 = vld [vmem:[%s4378_s8 + $0x1e8] sm:$0xff] }
  0x16   :  { %89 = vst [vmem:[#allocation3 + $0x80] sm:$0xff] %v88_v20  ;;  %v172_v62 = vld [vmem:[%s4378_s8 + $0x1f0] sm:$0xff]  ;;  %v174_v63 = vld [vmem:[%s4378_s8 + $0x1f8] sm:$0xff]  ;;  %v176_v0 = vld [vmem:[%s4378_s8 + $0x200] sm:$0xff] }
  0x17   :  { %91 = vst [vmem:[#allocation3 + $0x1a8] sm:$0xff] %v90_v21  ;;  %v178_v1 = vld [vmem:[%s4378_s8 + $0x208] sm:$0xff]  ;;  %v180_v2 = vld [vmem:[%s4378_s8 + $0x210] sm:$0xff]  ;;  %v182_v3 = vld [vmem:[%s4378_s8 + $0x218] sm:$0xff] }
  0x18   :  { %93 = vst [vmem:[#allocation3 + $0x1b8] sm:$0xff] %v92_v22  ;;  %v184_v4 = vld [vmem:[%s4378_s8 + $0x220] sm:$0xff]  ;;  %v186_v5 = vld [vmem:[%s4378_s8 + $0x228] sm:$0xff]  ;;  %v188_v6 = vld [vmem:[%s4378_s8 + $0x230] sm:$0xff] }
  0x19   :  { %95 = vst [vmem:[#allocation3 + $0x168] sm:$0xff] %v94_v23  ;;  %v190_v7 = vld [vmem:[%s4378_s8 + $0x238] sm:$0xff]  ;;  %v192_v8 = vld [vmem:[%s4378_s8 + $0x240] sm:$0xff]  ;;  %v194_v9 = vld [vmem:[%s4378_s8 + $0x248] sm:$0xff] }
  0x1a   :  { %97 = vst [vmem:[#allocation3 + $0x3e8] sm:$0xff] %v96_v24  ;;  %v196_v10 = vld [vmem:[%s4378_s8 + $0x250] sm:$0xff]  ;;  %v198_v11 = vld [vmem:[%s4378_s8 + $0x258] sm:$0xff]  ;;  %v200_v12 = vld [vmem:[%s4378_s8 + $0x260] sm:$0xff] }
  0x1b   :  { %99 = vst [vmem:[#allocation3 + $0x2f8] sm:$0xff] %v98_v25  ;;  %v202_v13 = vld [vmem:[%s4378_s8 + $0x268] sm:$0xff]  ;;  %v204_v14 = vld [vmem:[%s4378_s8 + $0x270] sm:$0xff]  ;;  %v206_v15 = vld [vmem:[%s4378_s8 + $0x278] sm:$0xff] }
  0x1c   :  { %101 = vst [vmem:[#allocation3 + $0x290] sm:$0xff] %v100_v26  ;;  %v208_v16 = vld [vmem:[%s4378_s8 + $0x280] sm:$0xff]  ;;  %v210_v17 = vld [vmem:[%s4378_s8 + $0x288] sm:$0xff]  ;;  %v212_v18 = vld [vmem:[%s4378_s8 + $0x290] sm:$0xff] }
  0x1d   :  { %103 = vst [vmem:[#allocation3 + $0x28] sm:$0xff] %v102_v27  ;;  %v214_v19 = vld [vmem:[%s4378_s8 + $0x298] sm:$0xff]  ;;  %v216_v20 = vld [vmem:[%s4378_s8 + $0x2a0] sm:$0xff]  ;;  %v218_v21 = vld [vmem:[%s4378_s8 + $0x2a8] sm:$0xff] }
  0x1e   :  { %105 = vst [vmem:[#allocation3 + $0x138] sm:$0xff] %v104_v28  ;;  %v220_v22 = vld [vmem:[%s4378_s8 + $0x2b0] sm:$0xff]  ;;  %v222_v23 = vld [vmem:[%s4378_s8 + $0x2b8] sm:$0xff]  ;;  %v224_v24 = vld [vmem:[%s4378_s8 + $0x2c0] sm:$0xff] }
  0x1f   :  { %107 = vst [vmem:[#allocation3 + $0xc0] sm:$0xff] %v106_v29  ;;  %v226_v25 = vld [vmem:[%s4378_s8 + $0x2c8] sm:$0xff]  ;;  %v228_v26 = vld [vmem:[%s4378_s8 + $0x2d0] sm:$0xff]  ;;  %v230_v27 = vld [vmem:[%s4378_s8 + $0x2d8] sm:$0xff] }
  0x20   :  { %109 = vst [vmem:[#allocation3 + $0x1c0] sm:$0xff] %v108_v30  ;;  %v232_v28 = vld [vmem:[%s4378_s8 + $0x2e0] sm:$0xff]  ;;  %v234_v29 = vld [vmem:[%s4378_s8 + $0x2e8] sm:$0xff]  ;;  %v236_v30 = vld [vmem:[%s4378_s8 + $0x2f0] sm:$0xff] }
  0x21   :  { %111 = vst [vmem:[#allocation3 + $0x280] sm:$0xff] %v110_v31  ;;  %v238_v31 = vld [vmem:[%s4378_s8 + $0x2f8] sm:$0xff] }
  0x22   :  { %113 = vst [vmem:[#allocation3 + $0x100] sm:$0xff] %v112_v32  ;;  %v240_v32 = vld [vmem:[%s4378_s8 + $0x300] sm:$0xff] }
  0x23   :  { %115 = vst [vmem:[#allocation3 + $0x3c0] sm:$0xff] %v114_v33  ;;  %v242_v33 = vld [vmem:[%s4378_s8 + $0x308] sm:$0xff] }
  0x24   :  { %117 = vst [vmem:[#allocation3 + $0x158] sm:$0xff] %v116_v34  ;;  %v244_v34 = vld [vmem:[%s4378_s8 + $0x310] sm:$0xff] }
  0x25   :  { %119 = vst [vmem:[#allocation3 + $0x3e0] sm:$0xff] %v118_v35  ;;  %v246_v35 = vld [vmem:[%s4378_s8 + $0x318] sm:$0xff] }
  0x26   :  { %121 = vst [vmem:[#allocation3 + $0x218] sm:$0xff] %v120_v36  ;;  %v248_v36 = vld [vmem:[%s4378_s8 + $0x320] sm:$0xff] }
  0x27   :  { %123 = vst [vmem:[#allocation3 + $0x3f8] sm:$0xff] %v122_v37  ;;  %v250_v37 = vld [vmem:[%s4378_s8 + $0x328] sm:$0xff] }
  0x28   :  { %125 = vst [vmem:[#allocation3 + $0x8] sm:$0xff] %v124_v38  ;;  %v252_v38 = vld [vmem:[%s4378_s8 + $0x330] sm:$0xff] }
  0x29   :  { %127 = vst [vmem:[#allocation3 + $0x128] sm:$0xff] %v126_v39  ;;  %v254_v39 = vld [vmem:[%s4378_s8 + $0x338] sm:$0xff] }
  0x2a   :  { %129 = vst [vmem:[#allocation3 + $0x2a0] sm:$0xff] %v128_v40  ;;  %v256_v40 = vld [vmem:[%s4378_s8 + $0x340] sm:$0xff] }
  0x2b   :  { %131 = vst [vmem:[#allocation3 + $0x3f0] sm:$0xff] %v130_v41  ;;  %v258_v41 = vld [vmem:[%s4378_s8 + $0x348] sm:$0xff] }
  0x2c   :  { %133 = vst [vmem:[#allocation3 + $0xa0] sm:$0xff] %v132_v42  ;;  %v260_v42 = vld [vmem:[%s4378_s8 + $0x350] sm:$0xff] }
  0x2d   :  { %135 = vst [vmem:[#allocation3 + $0x2c0] sm:$0xff] %v134_v43  ;;  %v262_v43 = vld [vmem:[%s4378_s8 + $0x358] sm:$0xff] }
  0x2e   :  { %137 = vst [vmem:[#allocation3 + $0xb0] sm:$0xff] %v136_v44  ;;  %v264_v44 = vld [vmem:[%s4378_s8 + $0x360] sm:$0xff] }
  0x2f   :  { %139 = vst [vmem:[#allocation3 + $0x1e0] sm:$0xff] %v138_v45  ;;  %v266_v45 = vld [vmem:[%s4378_s8 + $0x368] sm:$0xff] }
  0x30   :  { %141 = vst [vmem:[#allocation3 + $0x1f0] sm:$0xff] %v140_v46  ;;  %v268_v46 = vld [vmem:[%s4378_s8 + $0x370] sm:$0xff] }
  0x31   :  { %143 = vst [vmem:[#allocation3 + $0x10] sm:$0xff] %v142_v47  ;;  %v270_v47 = vld [vmem:[%s4378_s8 + $0x378] sm:$0xff] }
  0x32   :  { %145 = vst [vmem:[#allocation3 + $0x230] sm:$0xff] %v144_v48  ;;  %v272_v48 = vld [vmem:[%s4378_s8 + $0x380] sm:$0xff] }
  0x33   :  { %147 = vst [vmem:[#allocation3 + $0x240] sm:$0xff] %v146_v49  ;;  %v274_v49 = vld [vmem:[%s4378_s8 + $0x388] sm:$0xff] }
  0x34   :  { %149 = vst [vmem:[#allocation3 + $0x90] sm:$0xff] %v148_v50  ;;  %v276_v50 = vld [vmem:[%s4378_s8 + $0x390] sm:$0xff] }
  0x35   :  { %151 = vst [vmem:[#allocation3 + $0x3a0] sm:$0xff] %v150_v51  ;;  %v278_v51 = vld [vmem:[%s4378_s8 + $0x398] sm:$0xff] }
  0x36   :  { %153 = vst [vmem:[#allocation3 + $0x208] sm:$0xff] %v152_v52  ;;  %v280_v52 = vld [vmem:[%s4378_s8 + $0x3a0] sm:$0xff] }
  0x37   :  { %155 = vst [vmem:[#allocation3 + $0xd0] sm:$0xff] %v154_v53  ;;  %v282_v53 = vld [vmem:[%s4378_s8 + $0x3a8] sm:$0xff] }
  0x38   :  { %157 = vst [vmem:[#allocation3 + $0x88] sm:$0xff] %v156_v54  ;;  %v284_v54 = vld [vmem:[%s4378_s8 + $0x3b0] sm:$0xff] }
  0x39   :  { %159 = vst [vmem:[#allocation3 + $0x2f0] sm:$0xff] %v158_v55  ;;  %v286_v55 = vld [vmem:[%s4378_s8 + $0x3b8] sm:$0xff] }
  0x3a   :  { %161 = vst [vmem:[#allocation3 + $0x358] sm:$0xff] %v160_v56  ;;  %v288_v56 = vld [vmem:[%s4378_s8 + $0x3c0] sm:$0xff] }
  0x3b   :  { %163 = vst [vmem:[#allocation3 + $0x268] sm:$0xff] %v162_v57  ;;  %v290_v57 = vld [vmem:[%s4378_s8 + $0x3c8] sm:$0xff] }
  0x3c   :  { %165 = vst [vmem:[#allocation3 + $0x350] sm:$0xff] %v164_v58  ;;  %v292_v58 = vld [vmem:[%s4378_s8 + $0x3d0] sm:$0xff] }
  0x3d   :  { %167 = vst [vmem:[#allocation3 + $0x188] sm:$0xff] %v166_v59  ;;  %v294_v59 = vld [vmem:[%s4378_s8 + $0x3d8] sm:$0xff] }
  0x3e   :  { %169 = vst [vmem:[#allocation3 + $0x1d8] sm:$0xff] %v168_v60  ;;  %v296_v60 = vld [vmem:[%s4378_s8 + $0x3e0] sm:$0xff] }
  0x3f   :  { %171 = vst [vmem:[#allocation3 + $0x30] sm:$0xff] %v170_v61  ;;  %v298_v61 = vld [vmem:[%s4378_s8 + $0x3e8] sm:$0xff] }
  0x40   :  { %173 = vst [vmem:[#allocation3 + $0x140] sm:$0xff] %v172_v62  ;;  %v300_v62 = vld [vmem:[%s4378_s8 + $0x3f0] sm:$0xff] }
  0x41   :  { %175 = vst [vmem:[#allocation3 + $0x2a8] sm:$0xff] %v174_v63  ;;  %v302_v63 = vld [vmem:[%s4378_s8 + $0x3f8] sm:$0xff] }
  0x42   :  { %177 = vst [vmem:[#allocation3 + $0x130] sm:$0xff] %v176_v0  ;;  %v314_v0 = vld [vmem:[%s4371_s1] sm:$0xff] }
  0x43   :  { %179 = vst [vmem:[#allocation3 + $0x200] sm:$0xff] %v178_v1  ;;  %v3332_v1 = vmov 0  }
  0x44   :  { %181 = vst [vmem:[#allocation3 + $0x318] sm:$0xff] %v180_v2  ;;  %3251 = vset.pattern.permute.xlu0 %v3332_v1 }
  0x45   :  { %183 = vst [vmem:[#allocation3 + $0x220] sm:$0xff] %v182_v3 }
  0x46   :  { %185 = vst [vmem:[#allocation3 + $0x70] sm:$0xff] %v184_v4 }
  0x47   :  { %187 = vst [vmem:[#allocation3 + $0x300] sm:$0xff] %v186_v5 }
  0x48   :  { %189 = vst [vmem:[#allocation3 + $0xe0] sm:$0xff] %v188_v6 }
  0x49   :  { %191 = vst [vmem:[#allocation3 + $0x178] sm:$0xff] %v190_v7 }
  0x4a   :  { %193 = vst [vmem:[#allocation3 + $0x328] sm:$0xff] %v192_v8 }
  0x4b   :  { %195 = vst [vmem:[#allocation3 + $0x260] sm:$0xff] %v194_v9 }
  0x4c   :  { %197 = vst [vmem:[#allocation3 + $0x3b8] sm:$0xff] %v196_v10 }
  0x4d   :  { %199 = vst [vmem:[#allocation3 + $0x2b8] sm:$0xff] %v198_v11 }
  0x4e   :  { %201 = vst [vmem:[#allocation3 + $0x248] sm:$0xff] %v200_v12 }
  0x4f   :  { %203 = vst [vmem:[#allocation3 + $0x40] sm:$0xff] %v202_v13 }
  0x50   :  { %205 = vst [vmem:[#allocation3 + $0x20] sm:$0xff] %v204_v14 }
  0x51   :  { %207 = vst [vmem:[#allocation3 + $0xe8] sm:$0xff] %v206_v15 }
  0x52   :  { %209 = vst [vmem:[#allocation3 + $0x288] sm:$0xff] %v208_v16 }
  0x53   :  { %211 = vst [vmem:[#allocation3 + $0x3a8] sm:$0xff] %v210_v17 }
  0x54   :  { %213 = vst [vmem:[#allocation3 + $0x3c8] sm:$0xff] %v212_v18 }
  0x55   :  { %215 = vst [vmem:[#allocation3 + $0x160] sm:$0xff] %v214_v19 }
  0x56   :  { %217 = vst [vmem:[#allocation3 + $0x2c8] sm:$0xff] %v216_v20 }
  0x57   :  { %219 = vst [vmem:[#allocation3 + $0x210] sm:$0xff] %v218_v21 }
  0x58   :  { %221 = vst [vmem:[#allocation3 + $0x3d8] sm:$0xff] %v220_v22 }
  0x59   :  { %223 = vst [vmem:[#allocation3 + $0x1e8] sm:$0xff] %v222_v23 }
  0x5a   :  { %225 = vst [vmem:[#allocation3 + $0x1b0] sm:$0xff] %v224_v24 }
  0x5b   :  { %227 = vst [vmem:[#allocation3 + $0x1c8] sm:$0xff] %v226_v25 }
  0x5c   :  { %229 = vst [vmem:[#allocation3 + $0x2d0] sm:$0xff] %v228_v26 }
  0x5d   :  { %231 = vst [vmem:[#allocation3 + $0x1d0] sm:$0xff] %v230_v27 }
  0x5e   :  { %233 = vst [vmem:[#allocation3 + $0x58] sm:$0xff] %v232_v28 }
  0x5f   :  { %235 = vst [vmem:[#allocation3 + $0x120] sm:$0xff] %v234_v29 }
  0x60   :  { %237 = vst [vmem:[#allocation3 + $0x198] sm:$0xff] %v236_v30 }
  0x61   :  { %239 = vst [vmem:[#allocation3 + $0x2e8] sm:$0xff] %v238_v31 }
  0x62   :  { %241 = vst [vmem:[#allocation3 + $0x1f8] sm:$0xff] %v240_v32 }
  0x63   :  { %243 = vst [vmem:[#allocation3 + $0x238] sm:$0xff] %v242_v33 }
  0x64   :  { %245 = vst [vmem:[#allocation3 + $0x398] sm:$0xff] %v244_v34 }
  0x65   :  { %247 = vst [vmem:[#allocation3 + $0x390] sm:$0xff] %v246_v35 }
  0x66   :  { %249 = vst [vmem:[#allocation3 + $0x1a0] sm:$0xff] %v248_v36 }
  0x67   :  { %251 = vst [vmem:[#allocation3 + $0xa8] sm:$0xff] %v250_v37 }
  0x68   :  { %253 = vst [vmem:[#allocation3 + $0x258] sm:$0xff] %v252_v38 }
  0x69   :  { %255 = vst [vmem:[#allocation3 + $0x2d8] sm:$0xff] %v254_v39 }
  0x6a   :  { %257 = vst [vmem:[#allocation3 + $0xf0] sm:$0xff] %v256_v40 }
  0x6b   :  { %259 = vst [vmem:[#allocation3 + $0x180] sm:$0xff] %v258_v41 }
  0x6c   :  { %261 = vst [vmem:[#allocation3 + $0x170] sm:$0xff] %v260_v42 }
  0x6d   :  { %263 = vst [vmem:[#allocation3 + $0x3d0] sm:$0xff] %v262_v43 }
  0x6e   :  { %265 = vst [vmem:[#allocation3 + $0x250] sm:$0xff] %v264_v44 }
  0x6f   :  { %267 = vst [vmem:[#allocation3 + $0x378] sm:$0xff] %v266_v45 }
  0x70   :  { %269 = vst [vmem:[#allocation3 + $0xb8] sm:$0xff] %v268_v46 }
  0x71   :  { %271 = vst [vmem:[#allocation3 + $0x38] sm:$0xff] %v270_v47 }
  0x72   :  { %273 = vst [vmem:[#allocation3 + $0x78] sm:$0xff] %v272_v48 }
  0x73   :  { %275 = vst [vmem:[#allocation3 + $0x308] sm:$0xff] %v274_v49 }
  0x74   :  { %277 = vst [vmem:[#allocation3 + $0x370] sm:$0xff] %v276_v50 }
  0x75   :  { %279 = vst [vmem:[#allocation3 + $0xc8] sm:$0xff] %v278_v51 }
  0x76   :  { %281 = vst [vmem:[#allocation3 + $0x278] sm:$0xff] %v280_v52 }
  0x77   :  { %283 = vst [vmem:[#allocation3 + $0x360] sm:$0xff] %v282_v53 }
  0x78   :  { %285 = vst [vmem:[#allocation3 + $0x228] sm:$0xff] %v284_v54 }
  0x79   :  { %287 = vst [vmem:[#allocation3 + $0x348] sm:$0xff] %v286_v55 }
  0x7a   :  { %289 = vst [vmem:[#allocation3 + $0x148] sm:$0xff] %v288_v56 }
  0x7b   :  { %291 = vst [vmem:[#allocation3 + $0xf8] sm:$0xff] %v290_v57 }
  0x7c   :  { %293 = vst [vmem:[#allocation3 + $0x68] sm:$0xff] %v292_v58 }
  0x7d   :  { %295 = vst [vmem:[#allocation3] sm:$0xff] %v294_v59 }
  0x7e   :  { %297 = vst [vmem:[#allocation3 + $0x298] sm:$0xff] %v296_v60 }
  0x7f   :  { %299 = vst [vmem:[#allocation3 + $0x270] sm:$0xff] %v298_v61 }
  0x80   :  { %301 = vst [vmem:[#allocation3 + $0x310] sm:$0xff] %v300_v62 }
  0x81   :  { %303 = vst [vmem:[#allocation3 + $0x190] sm:$0xff] %v302_v63 }
  0x82   :  { %309 = vsyncadd [#allocation4], 16384  ;;  %3252 = vset.pattern.permute.xlu1 %v3332_v1  ;;  %317 = vperm.xlu0 %3251, %v314_v0   ;;  %v324_v2 = vld [vmem:[%s4372_s2] sm:$0xff]  ;;  %v312_v5 = vld [vmem:[%s4370_s0 + $0x10] sm:$0xff]  ;;  %s3333_s2 = smov 111   ;;  %s3334_s15 = smov 112   ;;  %v342_v19 = vlaneseq }
  0x83   :  { %v310_v4 = vld [vmem:[%s4370_s0] sm:$0xff]  ;;  %v313_v6 = vld [vmem:[%s4370_s0 + $0x18] sm:$0xff]  ;;  %s3335_s16 = smov 113   ;;  %s3336_s17 = smov 127   ;;  %v311_v14 = vld [vmem:[%s4370_s0 + $0x8] sm:$0xff]  ;;  %vm638_vm8 = vcmask 588800  }
  0x84   :  { %s3337_s20 = smov 1   ;;  %s3338_s0 = smov 15   ;;  %v3886_v21 = vand.u32 127, %v342_v19  ;;  %v2560_v22 = vld [vmem:[%s4373_s3 + $0x20] sm:$0xf]  ;;  %vm1216_vm13 = vcmask 1040384  }
  0x85   :  { %s3339_s21 = smov 16   ;;  %s3340_s22 = smov 17   ;;  %v582_v23 = vperm.slane %v2560_v22, 3  ;;  %v579_v29 = vperm.slane %v2560_v22, 0  ;;  %v580_v30 = vperm.slane %v2560_v22, 1  ;;  %v581_v31 = vperm.slane %v2560_v22, 2 }
  0x86   :  { %vm571_vm0 = vcmp.lt.s32.totalorder %v3886_v21, 111  ;;  %v2559_v41 = vld [vmem:[%s4373_s3 + $0x1c] sm:$0xf]  ;;  %vm539_vm1 = vcmp.lt.s32.totalorder %v3886_v21, 112  ;;  %v3917_v50 = vld [vmem:[%s4373_s3 + $0x18] sm:$0xf] }
  0x87   :  { %v549_v42 = vperm.slane %v2559_v41, 2  ;;  %v550_v43 = vperm.slane %v2559_v41, 3  ;;  %v547_v51 = vperm.slane %v2559_v41, 0  ;;  %v548_v52 = vperm.slane %v2559_v41, 1  ;;  %v3959_v19 = vld [vmem:[%s4373_s3 + $0x8] sm:$0xf] }
  0x88   :  { %vm507_vm2 = vcmp.lt.s32.totalorder %v3886_v21, 113  ;;  %v517_v53 = vperm.slane %v3917_v50, 2  ;;  %v518_v54 = vperm.slane %v3917_v50, 3  ;;  %vm475_vm3 = vcmp.lt.s32.totalorder %v3886_v21, 127 }
  0x89   :  { %vm439_vm4 = vcmp.lt.s32.totalorder %v3886_v21, 1  ;;  %vm407_vm5 = vcmp.lt.s32.totalorder %v3886_v21, 15  ;;  %vm375_vm6 = vcmp.lt.s32.totalorder %v3886_v21, 16  ;;  %vm344_vm7 = vcmp.lt.s32.totalorder %v3886_v21, 17 }
  0x8a   :  { %327 = vperm.xlu0 %3251, %v324_v2   ;;  %v2557_v2 = vld [vmem:[%s4373_s3 + $0x14] sm:$0xf] }
  0xf4   :  { %v318_v3 = vpop.permute.xlu0 %317 }
  0xf5   :  { %v320_v7 = vmul.f32 %v318_v3, %v310_v4  ;;  %v322_v8 = vmul.f32 %v318_v3, %v312_v5  ;;  %v323_v9 = vmul.f32 %v318_v3, %v313_v6  ;;  %v321_v15 = vmul.f32 %v318_v3, %v311_v14  ;;  %v3941_v6 = vld [vmem:[%s4373_s3 + $0xc] sm:$0xf] }
  0xf6   :  { %v485_v3 = vperm.slane %v2557_v2, 2  ;;  %v486_v4 = vperm.slane %v2557_v2, 3 }
  0xfc   :  { %v328_v10 = vpop.permute.xlu0 %327 }
  0xfd   :  { %v3809_v11 = vadd.f32 %v328_v10, %v320_v7  ;;  %v3811_v12 = vadd.f32 %v328_v10, %v322_v8  ;;  %v3813_v13 = vadd.f32 %v328_v10, %v323_v9  ;;  %v3836_v16 = vadd.f32 %v328_v10, %v321_v15 }
  0xfe   :  { %v450_v15 = vperm.slane %v3941_v6, 3 }
  0xff   :  { %569 = vrot.lane.b32.xlu2 %v3813_v13, %s3333_s2  ;;  %535 = vrot.lane.b32.xlu0 %v3811_v12, %s3334_s15 }
 0x100   :  { %563 = vrot.lane.b32.xlu1 %v3809_v11, %s3333_s2 }
 0x107   :  { %503 = vrot.lane.b32.xlu0 %v3811_v12, %s3335_s16  ;;  %531 = vrot.lane.b32.xlu2 %v3809_v11, %s3334_s15 }
 0x108   :  { %567 = vrot.lane.b32.xlu1 %v3811_v12, %s3333_s2 }
 0x10f   :  { %471 = vrot.lane.b32.xlu0 %v3811_v12, %s3336_s17  ;;  %499 = vrot.lane.b32.xlu2 %v3809_v11, %s3335_s16 }
 0x110   :  { %537 = vrot.lane.b32.xlu1 %v3813_v13, %s3334_s15 }
 0x117   :  { %533 = vrot.lane.b32.xlu0 %v3836_v16, %s3334_s15  ;;  %467 = vrot.lane.b32.xlu2 %v3809_v11, %s3336_s17 }
 0x118   :  { %505 = vrot.lane.b32.xlu1 %v3813_v13, %s3335_s16 }
 0x11f   :  { %437 = vrot.lane.b32.xlu0 %v3813_v13, %s3337_s20  ;;  %565 = vrot.lane.b32.xlu2 %v3836_v16, %s3333_s2 }
 0x120   :  { %473 = vrot.lane.b32.xlu1 %v3813_v13, %s3336_s17 }
 0x127   :  { %403 = vrot.lane.b32.xlu0 %v3811_v12, %s3338_s0  ;;  %435 = vrot.lane.b32.xlu2 %v3811_v12, %s3337_s20 }
 0x128   :  { %433 = vrot.lane.b32.xlu1 %v3836_v16, %s3337_s20 }
 0x12f   :  { %369 = vrot.lane.b32.xlu0 %v3836_v16, %s3339_s21  ;;  %401 = vrot.lane.b32.xlu2 %v3836_v16, %s3338_s0 }
 0x130   :  { %501 = vrot.lane.b32.xlu1 %v3836_v16, %s3335_s16 }
 0x137   :  { %336 = vrot.lane.b32.xlu0 %v3836_v16, %s3340_s22  ;;  %469 = vrot.lane.b32.xlu2 %v3836_v16, %s3336_s17 }
 0x138   :  { %405 = vrot.lane.b32.xlu1 %v3813_v13, %s3338_s0 }
 0x13f   :  { %431 = vrot.lane.b32.xlu0 %v3809_v11, %s3337_s20  ;;  %373 = vrot.lane.b32.xlu2 %v3813_v13, %s3339_s21 }
 0x140   :  { %371 = vrot.lane.b32.xlu1 %v3811_v12, %s3339_s21 }
 0x147   :  { %334 = vrot.lane.b32.xlu0 %v3809_v11, %s3340_s22  ;;  %340 = vrot.lane.b32.xlu2 %v3813_v13, %s3340_s22 }
 0x148   :  { %338 = vrot.lane.b32.xlu1 %v3811_v12, %s3340_s22 }
 0x14f   :  { %367 = vrot.lane.b32.xlu2 %v3809_v11, %s3339_s21 }
 0x150   :  { %399 = vrot.lane.b32.xlu1 %v3809_v11, %s3338_s0 }
 0x159   :  { %v570_v17 = vpop.permute.xlu2 %569 }
 0x161   :  { %v532_v18 = vpop.permute.xlu2 %531 }
 0x169   :  { %v3884_v20 = vpop.permute.xlu2 %499 }
 0x171   :  { %v536_v24 = vpop.permute.xlu0 %535  ;;  %v3892_v25 = vpop.permute.xlu2 %467 }
 0x172   :  { %v564_v26 = vpop.permute.xlu1 %563 }
 0x173   :  { %v575_v27 = vsel %vm571_vm0, %v570_v17, %v564_v26 }
 0x174   :  { %v590_v28 = vmul.f32 %v582_v23, %v575_v27  ;;  %v449_v23 = vperm.slane %v3941_v6, 2  ;;  %v417_v27 = vperm.slane %v3959_v19, 2 }
 0x176   :  { %709 = vmatpush.msra.mxu3 %v590_v28 }
 0x179   :  { %v3896_v32 = vpop.permute.xlu0 %503  ;;  %v566_v33 = vpop.permute.xlu2 %565 }
 0x17a   :  { %v568_v34 = vpop.permute.xlu1 %567  ;;  %v574_v35 = vsel %vm571_vm0, %v564_v26, %v566_v33 }
 0x17b   :  { %v587_v36 = vmul.f32 %v579_v29, %v574_v35  ;;  %v573_v37 = vsel %vm571_vm0, %v566_v33, %v568_v34  ;;  %v572_v38 = vsel %vm571_vm0, %v568_v34, %v570_v17  ;;  %v516_v33 = vperm.slane %v3917_v50, 1 }
 0x17c   :  { %v588_v39 = vmul.f32 %v580_v30, %v573_v37  ;;  %v589_v40 = vmul.f32 %v581_v31, %v572_v38  ;;  %v515_v31 = vperm.slane %v3917_v50, 0  ;;  %v484_v37 = vperm.slane %v2557_v2, 1 }
 0x17d   :  { %649 = vmatpush.msra.mxu0 %v587_v36  ;;  %v483_v36 = vperm.slane %v2557_v2, 0  ;;  %v447_v50 = vperm.slane %v3941_v6, 0 }
 0x17e   :  { %669 = vmatpush.msra.mxu1 %v588_v39  ;;  %689 = vmatpush.msra.mxu2 %v589_v40 }
 0x181   :  { %v3908_v44 = vpop.permute.xlu0 %471  ;;  %v436_v63 = vpop.permute.xlu2 %435 }
 0x182   :  { %v538_v45 = vpop.permute.xlu1 %537 }
 0x183   :  { %v540_v46 = vsel %vm539_vm1, %v536_v24, %v538_v45  ;;  %v543_v47 = vsel %vm539_vm1, %v538_v45, %v532_v18 }
 0x184   :  { %v557_v48 = vmul.f32 %v549_v42, %v540_v46  ;;  %v558_v49 = vmul.f32 %v550_v43, %v543_v47 }
 0x186   :  { %690 = vmatpush.msra.mxu2 %v557_v48  ;;  %710 = vmatpush.msra.mxu3 %v558_v49 }
 0x189   :  { %v534_v55 = vpop.permute.xlu0 %533 }
 0x18a   :  { %v541_v56 = vsel %vm539_vm1, %v534_v55, %v536_v24  ;;  %v542_v57 = vsel %vm539_vm1, %v532_v18, %v534_v55  ;;  %v506_v58 = vpop.permute.xlu1 %505  ;;  %v3954_v18 = vpop.permute.xlu2 %401 }
 0x18b   :  { %v508_v59 = vsel %vm507_vm2, %v3896_v32, %v506_v58  ;;  %v511_v60 = vsel %vm507_vm2, %v506_v58, %v3884_v20  ;;  %v555_v61 = vmul.f32 %v547_v51, %v542_v57  ;;  %v556_v62 = vmul.f32 %v548_v52, %v541_v56 }
 0x18c   :  { %v525_v0 = vmul.f32 %v517_v53, %v508_v59  ;;  %v526_v1 = vmul.f32 %v518_v54, %v511_v60  ;;  %v448_v51 = vperm.slane %v3941_v6, 1 }
 0x18d   :  { %650 = vmatpush.msra.mxu0 %v555_v61  ;;  %670 = vmatpush.msra.mxu1 %v556_v62 }
 0x18e   :  { %691 = vmatpush.msra.mxu2 %v525_v0  ;;  %711 = vmatpush.msra.mxu3 %v526_v1 }
 0x191   :  { %v3936_v5 = vpop.permute.xlu0 %437 }
 0x192   :  { %v474_v7 = vpop.permute.xlu1 %473  ;;  %v440_v17 = vsel %vm439_vm4, %v436_v63, %v3936_v5  ;;  %v470_v30 = vpop.permute.xlu2 %469 }
 0x193   :  { %v476_v8 = vsel %vm475_vm3, %v3908_v44, %v474_v7  ;;  %v479_v9 = vsel %vm475_vm3, %v474_v7, %v3892_v25  ;;  %v458_v22 = vmul.f32 %v450_v15, %v440_v17  ;;  %v477_v38 = vsel %vm475_vm3, %v470_v30, %v3908_v44 }
 0x194   :  { %v493_v10 = vmul.f32 %v485_v3, %v476_v8  ;;  %v494_v14 = vmul.f32 %v486_v4, %v479_v9  ;;  %v478_v39 = vsel %vm475_vm3, %v3892_v25, %v470_v30  ;;  %v492_v46 = vmul.f32 %v484_v37, %v477_v38  ;;  %v595_v8 = vld [vmem:[%s4374_s4] sm:$0xff] }
 0x195   :  { %v491_v45 = vmul.f32 %v483_v36, %v478_v39  ;;  %v418_v44 = vperm.slane %v3959_v19, 3 }
 0x196   :  { %692 = vmatpush.msra.mxu2 %v493_v10  ;;  %712 = vmatpush.msra.mxu3 %v494_v14  ;;  %v415_v10 = vperm.slane %v3959_v19, 0  ;;  %v416_v14 = vperm.slane %v3959_v19, 1 }
 0x198   :  { %693 = vmatpush.msra.mxu2 %v3811_v12  ;;  %713 = vmatpush.msra.mxu3 %v3813_v13 }
 0x199   :  { %v404_v24 = vpop.permute.xlu0 %403 }
 0x19a   :  { %714 = vmatpush.msra.mxu3 %v458_v22  ;;  %v434_v26 = vpop.permute.xlu1 %433  ;;  %v409_v28 = vsel %vm407_vm5, %v3954_v18, %v404_v24  ;;  %v374_v48 = vpop.permute.xlu2 %373 }
 0x19b   :  { %v441_v29 = vsel %vm439_vm4, %v434_v26, %v436_v63  ;;  %v425_v13 = vmul.f32 %v417_v27, %v409_v28  ;;  %v349_v63 = vld [vmem:[%s4373_s3] sm:$0xf] }
 0x19c   :  { %v457_v12 = vmul.f32 %v449_v23, %v441_v29  ;;  %v353_v1 = vperm.slane %v349_v63, 2  ;;  %v354_v2 = vperm.slane %v349_v63, 3 }
 0x19e   :  { %694 = vmatpush.msra.mxu2 %v457_v12  ;;  %v351_v12 = vperm.slane %v349_v63, 0 }
 0x1a0   :  { %695 = vmatpush.msra.mxu2 %v425_v13  ;;  %v352_v13 = vperm.slane %v349_v63, 1  ;;  %v2574_v63 = vld [vmem:[%s4373_s3 + $0x1c] sm:$0xf] }
 0x1a1   :  { %v3973_v34 = vpop.permute.xlu0 %369 }
 0x1a2   :  { %v502_v35 = vpop.permute.xlu1 %501  ;;  %v341_v0 = vpop.permute.xlu2 %340 }
 0x1a3   :  { %v509_v40 = vsel %vm507_vm2, %v502_v35, %v3896_v32  ;;  %v510_v41 = vsel %vm507_vm2, %v3884_v20, %v502_v35  ;;  %v632_v20 = vld [vmem:[%s4375_s5] sm:$0xff] }
 0x1a4   :  { %v523_v42 = vmul.f32 %v515_v31, %v510_v41  ;;  %v524_v43 = vmul.f32 %v516_v33, %v509_v40  ;;  %635 = vperm.xlu1 %3252, %v632_v20  }
 0x1a6   :  { %651 = vmatpush.msra.mxu0 %v523_v42  ;;  %671 = vmatpush.msra.mxu1 %v524_v43 }
 0x1a8   :  { %652 = vmatpush.msra.mxu0 %v491_v45  ;;  %672 = vmatpush.msra.mxu1 %v492_v46 }
 0x1a9   :  { %v337_v47 = vpop.permute.xlu0 %336 }
 0x1aa   :  { %653 = vmatpush.msra.mxu0 %v3809_v11  ;;  %673 = vmatpush.msra.mxu1 %v3836_v16  ;;  %v406_v25 = vpop.permute.xlu1 %405  ;;  %v2554_v11 = vld [vmem:[%s4373_s3 + $0x4] sm:$0xf]  ;;  %v368_v9 = vpop.permute.xlu2 %367 }
 0x1ab   :  { %v408_v32 = vsel %vm407_vm5, %v404_v24, %v406_v25  ;;  %v385_v16 = vperm.slane %v2554_v11, 2  ;;  %v386_v52 = vperm.slane %v2554_v11, 3  ;;  %v383_v22 = vperm.slane %v2554_v11, 0 }
 0x1ac   :  { %v426_v49 = vmul.f32 %v418_v44, %v408_v32  ;;  %v384_v23 = vperm.slane %v2554_v11, 1  ;;  %v378_v24 = vsel %vm375_vm6, %v368_v9, %v3973_v34 }
 0x1ae   :  { %715 = vmatpush.msra.mxu3 %v426_v49 }
 0x1b1   :  { %v432_v53 = vpop.permute.xlu0 %431 }
 0x1b2   :  { %v442_v54 = vsel %vm439_vm4, %v432_v53, %v434_v26  ;;  %v443_v55 = vsel %vm439_vm4, %v3936_v5, %v432_v53  ;;  %v372_v56 = vpop.permute.xlu1 %371  ;;  %v379_v26 = vsel %vm375_vm6, %v374_v48, %v368_v9 }
 0x1b3   :  { %v376_v57 = vsel %vm375_vm6, %v372_v56, %v374_v48  ;;  %v377_v58 = vsel %vm375_vm6, %v3973_v34, %v372_v56  ;;  %v455_v59 = vmul.f32 %v447_v50, %v443_v55  ;;  %v456_v60 = vmul.f32 %v448_v51, %v442_v54  ;;  %v1027_v55 = vld [vmem:[%s4377_s7] sm:$0xff] }
 0x1b4   :  { %v393_v61 = vmul.f32 %v385_v16, %v377_v58  ;;  %v394_v62 = vmul.f32 %v386_v52, %v376_v57  ;;  %v391_v33 = vmul.f32 %v383_v22, %v379_v26  ;;  %v392_v34 = vmul.f32 %v384_v23, %v378_v24 }
 0x1b5   :  { %654 = vmatpush.msra.mxu0 %v455_v59  ;;  %674 = vmatpush.msra.mxu1 %v456_v60  ;;  %v3341_v48 = vmov 0.0  }
 0x1b6   :  { %696 = vmatpush.msra.mxu2 %v393_v61  ;;  %716 = vmatpush.msra.mxu3 %v394_v62  ;;  %v2575_v62 = vld [vmem:[%s4373_s3 + $0x20] sm:$0xf] }
 0x1b9   :  { %v335_v15 = vpop.permute.xlu0 %334 }
 0x1ba   :  { %v339_v3 = vpop.permute.xlu1 %338  ;;  %v347_v30 = vsel %vm344_vm7, %v335_v15, %v337_v47  ;;  %v348_v31 = vsel %vm344_vm7, %v341_v0, %v335_v15  ;;  %v977_v15 = vperm.slane %v2575_v62, 3 }
 0x1bb   :  { %v345_v4 = vsel %vm344_vm7, %v339_v3, %v341_v0  ;;  %v346_v5 = vsel %vm344_vm7, %v337_v47, %v339_v3  ;;  %v360_v35 = vmul.f32 %v352_v13, %v347_v30  ;;  %v974_v0 = vperm.slane %v2575_v62, 0  ;;  %v4138_v3 = vld [vmem:[%s4373_s3 + $0x18] sm:$0xf] }
 0x1bc   :  { %v361_v6 = vmul.f32 %v353_v1, %v346_v5  ;;  %v362_v7 = vmul.f32 %v354_v2, %v345_v4  ;;  %v944_v5 = vperm.slane %v2574_v63, 0  ;;  %v914_v9 = vperm.slane %v4138_v3, 0 }
 0x1be   :  { %697 = vmatpush.msra.mxu2 %v361_v6  ;;  %717 = vmatpush.msra.mxu3 %v362_v7 }
 0x1bf   :  { %2563 = vmatmul.msk.f32.vlgmr.msra.gmra.mxu2 %vm638_vm8, %v595_v8  ;;  %2564 = vmatmul.msk.f32.vlgmr.msra.gmra.mxu3 %vm638_vm8, %v595_v8 }
 0x1c2   :  { %v400_v17 = vpop.permute.xlu1 %399 }
 0x1c3   :  { %v410_v27 = vsel %vm407_vm5, %v400_v17, %v3954_v18  ;;  %v411_v28 = vsel %vm407_vm5, %v406_v25, %v400_v17  ;;  %v359_v18 = vmul.f32 %v351_v12, %v348_v31  ;;  %v947_v12 = vperm.slane %v2574_v63, 3 }
 0x1c4   :  { %v423_v29 = vmul.f32 %v415_v10, %v411_v28  ;;  %v424_v19 = vmul.f32 %v416_v14, %v410_v27  ;;  %v2572_v28 = vld [vmem:[%s4373_s3 + $0x14] sm:$0xf] }
 0x1c5   :  { %v884_v13 = vperm.slane %v2572_v28, 0 }
 0x1c6   :  { %655 = vmatpush.msra.mxu0 %v423_v29  ;;  %675 = vmatpush.msra.mxu1 %v424_v19  ;;  %v975_v29 = vperm.slane %v2575_v62, 1  ;;  %v976_v19 = vperm.slane %v2575_v62, 2 }
 0x1c8   :  { %656 = vmatpush.msra.mxu0 %v391_v33  ;;  %676 = vmatpush.msra.mxu1 %v392_v34 }
 0x1ca   :  { %657 = vmatpush.msra.mxu0 %v359_v18  ;;  %677 = vmatpush.msra.mxu1 %v360_v35 }
 0x1cb   :  { %2561 = vmatmul.msk.f32.vlgmr.msra.gmra.mxu0 %vm638_vm8, %v595_v8  ;;  %2562 = vmatmul.msk.f32.vlgmr.msra.gmra.mxu1 %vm638_vm8, %v595_v8 }
 0x216   :  { %v636_v36 = vpop.permute.xlu1 %635 }
 0x242   :  { %v699_v37 = vpop.f32.mrf.mxu2  ;;  %v719_v38 = vpop.f32.mrf.mxu3 }
 0x243   :  { %v700_v39 = vadd.f32 %v699_v37, %v636_v36  ;;  %v720_v40 = vadd.f32 %v719_v38, %v636_v36 }
 0x245   :  { %v4062_v53 = vmax.f32 %v720_v40, 0.0  ;;  %v4070_v54 = vmax.f32 %v700_v39, 0.0 }
 0x248   :  { %v659_v41 = vpop.f32.mrf.mxu0  ;;  %v679_v42 = vpop.f32.mrf.mxu1 }
 0x249   :  { %v660_v43 = vadd.f32 %v659_v41, %v636_v36  ;;  %v680_v45 = vadd.f32 %v679_v42, %v636_v36  ;;  %v945_v41 = vperm.slane %v2574_v63, 1  ;;  %v946_v42 = vperm.slane %v2574_v63, 2 }
 0x24b   :  { %v722_v46 = vmul.f32 %v660_v43, %v660_v43  ;;  %v723_v44 = vmul.f32 %v680_v45, %v680_v45  ;;  %v724_v47 = vmul.f32 %v700_v39, %v660_v43  ;;  %v725_v25 = vmul.f32 %v720_v40, %v680_v45 }
 0x24c   :  { %v4042_v32 = vmax.f32 %v660_v43, 0.0  ;;  %v4044_v20 = vmax.f32 %v680_v45, 0.0  ;;  %v917_v43 = vperm.slane %v4138_v3, 3 }
 0x24d   :  { %vm726_vm9 = vcmp.gt.f32.partialorder %v722_v46, 0.0  ;;  %vm727_vm10 = vcmp.gt.f32.partialorder %v723_v44, 0.0  ;;  %vm728_vm11 = vcmp.gt.f32.partialorder %v724_v47, 0.0  ;;  %vm729_vm12 = vcmp.gt.f32.partialorder %v725_v25, 0.0 }
 0x24e   :  { %v2565_v49 = vsel %vm726_vm9, 1.0, %v3341_v48  ;;  %v2566_v50 = vsel %vm727_vm10, 1.0, %v3341_v48  ;;  %v2567_v51 = vsel %vm728_vm11, 1.0, %v3341_v48  ;;  %v2568_v11 = vsel %vm729_vm12, 1.0, %v3341_v48  ;;  %838 = vrot.lane.b32.xlu1 %v4044_v20, %s3337_s20  ;;  %932 = vrot.lane.b32.xlu0 %v4044_v20, %s3334_s15 }
 0x24f   :  { %v738_v16 = vpack.c.bf16 %v2566_v50, %v2565_v49  ;;  %v739_v52 = vpack.c.bf16 %v2568_v11, %v2567_v51  ;;  %960 = vrot.lane.b32.xlu2 %v4042_v32, %s3333_s2  ;;  %v915_v11 = vperm.slane %v4138_v3, 1 }
 0x251   :  { %740 = vst [vmem:[#allocation5] sm:$0xff] %v738_v16  ;;  %v887_v16 = vperm.slane %v2572_v28, 3 }
 0x252   :  { %741 = vst [vmem:[#allocation5 + $0x8] sm:$0xff] %v739_v52 }
 0x256   :  { %902 = vrot.lane.b32.xlu1 %v4044_v20, %s3335_s16  ;;  %778 = vrot.lane.b32.xlu0 %v4044_v20, %s3339_s21 }
 0x257   :  { %930 = vrot.lane.b32.xlu2 %v4042_v32, %s3334_s15 }
 0x25e   :  { %966 = vrot.lane.b32.xlu1 %v4062_v53, %s3333_s2  ;;  %748 = vrot.lane.b32.xlu0 %v4044_v20, %s3340_s22 }
 0x25f   :  { %900 = vrot.lane.b32.xlu2 %v4042_v32, %s3335_s16 }
 0x266   :  { %936 = vrot.lane.b32.xlu1 %v4062_v53, %s3334_s15  ;;  %964 = vrot.lane.b32.xlu0 %v4070_v54, %s3333_s2 }
 0x267   :  { %870 = vrot.lane.b32.xlu2 %v4042_v32, %s3336_s17 }
 0x26e   :  { %906 = vrot.lane.b32.xlu1 %v4062_v53, %s3335_s16  ;;  %934 = vrot.lane.b32.xlu0 %v4070_v54, %s3334_s15 }
 0x26f   :  { %962 = vrot.lane.b32.xlu2 %v4044_v20, %s3333_s2 }
 0x276   :  { %876 = vrot.lane.b32.xlu1 %v4062_v53, %s3336_s17  ;;  %904 = vrot.lane.b32.xlu0 %v4070_v54, %s3335_s16 }
 0x277   :  { %808 = vrot.lane.b32.xlu2 %v4044_v20, %s3338_s0 }
 0x27e   :  { %812 = vrot.lane.b32.xlu1 %v4062_v53, %s3338_s0  ;;  %874 = vrot.lane.b32.xlu0 %v4070_v54, %s3336_s17 }
 0x27f   :  { %872 = vrot.lane.b32.xlu2 %v4044_v20, %s3336_s17 }
 0x286   :  { %780 = vrot.lane.b32.xlu1 %v4070_v54, %s3339_s21  ;;  %842 = vrot.lane.b32.xlu0 %v4062_v53, %s3337_s20 }
 0x287   :  { %840 = vrot.lane.b32.xlu2 %v4070_v54, %s3337_s20 }
 0x28e   :  { %750 = vrot.lane.b32.xlu1 %v4070_v54, %s3340_s22  ;;  %810 = vrot.lane.b32.xlu0 %v4070_v54, %s3338_s0 }
 0x28f   :  { %782 = vrot.lane.b32.xlu2 %v4062_v53, %s3339_s21 }
 0x296   :  { %806 = vrot.lane.b32.xlu1 %v4042_v32, %s3338_s0  ;;  %836 = vrot.lane.b32.xlu0 %v4042_v32, %s3337_s20 }
 0x297   :  { %752 = vrot.lane.b32.xlu2 %v4062_v53, %s3340_s22 }
 0x29e   :  { %1030 = vperm.xlu1 %3252, %v1027_v55   ;;  %746 = vrot.lane.b32.xlu0 %v4042_v32, %s3340_s22 }
 0x29f   :  { %776 = vrot.lane.b32.xlu2 %v4042_v32, %s3339_s21 }
 0x2a9   :  { %v961_v56 = vpop.permute.xlu2 %960 }
 0x2b1   :  { %v931_v57 = vpop.permute.xlu2 %930 }
 0x2b9   :  { %v901_v58 = vpop.permute.xlu2 %900 }
 0x2c0   :  { %v4121_v59 = vpop.permute.xlu1 %838  ;;  %v933_v60 = vpop.permute.xlu0 %932 }
 0x2c1   :  { %v4123_v61 = vpop.permute.xlu2 %870  ;;  %v940_v6 = vsel %vm539_vm1, %v931_v57, %v933_v60 }
 0x2c2   :  { %v952_v14 = vmul.f32 %v944_v5, %v940_v6 }
 0x2c8   :  { %v4131_v1 = vpop.permute.xlu1 %902  ;;  %v4133_v2 = vpop.permute.xlu0 %778 }
 0x2c9   :  { %v963_v4 = vpop.permute.xlu2 %962  ;;  %v910_v10 = vsel %vm507_vm2, %v901_v58, %v4131_v1 }
 0x2ca   :  { %v970_v7 = vsel %vm571_vm0, %v961_v56, %v963_v4  ;;  %v922_v17 = vmul.f32 %v914_v9, %v910_v10 }
 0x2cb   :  { %v982_v8 = vmul.f32 %v974_v0, %v970_v7 }
 0x2cd   :  { %1043 = vmatpush.msrb.mxu0 %v982_v8 }
 0x2cf   :  { %1044 = vmatpush.msrb.mxu0 %v952_v14 }
 0x2d0   :  { %v967_v22 = vpop.permute.xlu1 %966  ;;  %v4148_v23 = vpop.permute.xlu0 %748 }
 0x2d1   :  { %v971_v24 = vsel %vm571_vm0, %v967_v22, %v961_v56  ;;  %1045 = vmatpush.msrb.mxu0 %v922_v17  ;;  %v4152_v26 = vpop.permute.xlu2 %808 }
 0x2d2   :  { %v985_v27 = vmul.f32 %v977_v15, %v971_v24 }
 0x2d4   :  { %1103 = vmatpush.msrb.mxu3 %v985_v27 }
 0x2d8   :  { %v937_v30 = vpop.permute.xlu1 %936  ;;  %v965_v31 = vpop.permute.xlu0 %964 }
 0x2d9   :  { %v941_v33 = vsel %vm539_vm1, %v937_v30, %v931_v57  ;;  %v968_v34 = vsel %vm571_vm0, %v965_v31, %v967_v22  ;;  %v969_v18 = vsel %vm571_vm0, %v963_v4, %v965_v31  ;;  %v873_v35 = vpop.permute.xlu2 %872  ;;  %v886_v4 = vperm.slane %v2572_v28, 2 }
 0x2da   :  { %v880_v36 = vsel %vm475_vm3, %v4123_v61, %v873_v35  ;;  %v983_v37 = vmul.f32 %v975_v29, %v969_v18  ;;  %v984_v38 = vmul.f32 %v976_v19, %v968_v34  ;;  %v955_v39 = vmul.f32 %v947_v12, %v941_v33  ;;  %v2570_v29 = vld [vmem:[%s4373_s3 + $0x8] sm:$0xf] }
 0x2db   :  { %v892_v40 = vmul.f32 %v884_v13, %v880_v36  ;;  %v823_v12 = vperm.slane %v2570_v29, 3  ;;  %v758_v13 = vld [vmem:[%s4373_s3] sm:$0xf] }
 0x2dc   :  { %1063 = vmatpush.msrb.mxu1 %v983_v37  ;;  %1083 = vmatpush.msrb.mxu2 %v984_v38 }
 0x2dd   :  { %1046 = vmatpush.msrb.mxu0 %v892_v40  ;;  %1104 = vmatpush.msrb.mxu3 %v955_v39  ;;  %v762_v40 = vperm.slane %v758_v13, 2 }
 0x2df   :  { %1047 = vmatpush.msrb.mxu0 %v4042_v32  ;;  %v916_v32 = vperm.slane %v4138_v3, 2  ;;  %v885_v3 = vperm.slane %v2572_v28, 1 }
 0x2e0   :  { %v907_v45 = vpop.permute.xlu1 %906  ;;  %v935_v46 = vpop.permute.xlu0 %934 }
 0x2e1   :  { %v911_v44 = vsel %vm507_vm2, %v907_v45, %v901_v58  ;;  %v938_v47 = vsel %vm539_vm1, %v935_v46, %v937_v30  ;;  %v939_v25 = vsel %vm539_vm1, %v933_v60, %v935_v46  ;;  %v841_v56 = vpop.permute.xlu2 %840 }
 0x2e2   :  { %v953_v49 = vmul.f32 %v945_v41, %v939_v25  ;;  %v954_v50 = vmul.f32 %v946_v42, %v938_v47  ;;  %v925_v51 = vmul.f32 %v917_v43, %v911_v44  ;;  %v763_v41 = vperm.slane %v758_v13, 3  ;;  %v990_v25 = vld [vmem:[%s4376_s6] sm:$0xff] }
 0x2e4   :  { %1064 = vmatpush.msrb.mxu1 %v953_v49  ;;  %1084 = vmatpush.msrb.mxu2 %v954_v50 }
 0x2e5   :  { %1105 = vmatpush.msrb.mxu3 %v925_v51 }
 0x2e8   :  { %v877_v52 = vpop.permute.xlu1 %876  ;;  %v905_v55 = vpop.permute.xlu0 %904 }
 0x2e9   :  { %v881_v57 = vsel %vm475_vm3, %v877_v52, %v4123_v61  ;;  %v908_v58 = vsel %vm507_vm2, %v905_v55, %v907_v45  ;;  %v909_v60 = vsel %vm507_vm2, %v4131_v1, %v905_v55  ;;  %v4188_v61 = vld [vmem:[%s4373_s3 + $0xc] sm:$0xf]  ;;  %v4198_v14 = vpop.permute.xlu2 %782 }
 0x2ea   :  { %v923_v62 = vmul.f32 %v915_v11, %v909_v60  ;;  %v924_v63 = vmul.f32 %v916_v32, %v908_v58  ;;  %v895_v0 = vmul.f32 %v887_v16, %v881_v57  ;;  %v852_v10 = vperm.slane %v4188_v61, 2 }
 0x2eb   :  { %v853_v17 = vperm.slane %v4188_v61, 3  ;;  %v850_v49 = vperm.slane %v4188_v61, 0  ;;  %v851_v50 = vperm.slane %v4188_v61, 1  ;;  %v820_v16 = vperm.slane %v2570_v29, 0 }
 0x2ec   :  { %1065 = vmatpush.msrb.mxu1 %v923_v62  ;;  %1085 = vmatpush.msrb.mxu2 %v924_v63 }
 0x2ed   :  { %1106 = vmatpush.msrb.mxu3 %v895_v0 }
 0x2ef   :  { %1107 = vmatpush.msrb.mxu3 %v4062_v53  ;;  %v845_v53 = vsel %vm439_vm4, %v4121_v59, %v841_v56 }
 0x2f0   :  { %v813_v5 = vpop.permute.xlu1 %812  ;;  %v875_v6 = vpop.permute.xlu0 %874  ;;  %v860_v15 = vmul.f32 %v852_v10, %v845_v53 }
 0x2f1   :  { %v878_v1 = vsel %vm475_vm3, %v875_v6, %v877_v52  ;;  %v879_v7 = vsel %vm475_vm3, %v873_v35, %v875_v6  ;;  %v4208_v19 = vpop.permute.xlu2 %752  ;;  %v821_v52 = vperm.slane %v2570_v29, 1  ;;  %v760_v6 = vperm.slane %v758_v13, 0 }
 0x2f2   :  { %v893_v8 = vmul.f32 %v885_v3, %v879_v7  ;;  %v894_v9 = vmul.f32 %v886_v4, %v878_v1  ;;  %v761_v1 = vperm.slane %v758_v13, 1 }
 0x2f4   :  { %1066 = vmatpush.msrb.mxu1 %v893_v8  ;;  %1086 = vmatpush.msrb.mxu2 %v894_v9 }
 0x2f6   :  { %1067 = vmatpush.msrb.mxu1 %v4044_v20  ;;  %1087 = vmatpush.msrb.mxu2 %v4070_v54  ;;  %v2569_v20 = vld [vmem:[%s4373_s3 + $0x4] sm:$0xf]  ;;  %v822_v54 = vperm.slane %v2570_v29, 2 }
 0x2f7   :  { %v792_v33 = vperm.slane %v2569_v20, 2  ;;  %v793_v34 = vperm.slane %v2569_v20, 3  ;;  %v790_v63 = vperm.slane %v2569_v20, 0  ;;  %v791_v0 = vperm.slane %v2569_v20, 1 }
 0x2f8   :  { %v781_v22 = vpop.permute.xlu1 %780  ;;  %v843_v24 = vpop.permute.xlu0 %842  ;;  %1088 = vmatpush.msrb.mxu2 %v860_v15 }
 0x2f9   :  { %v844_v27 = vsel %vm439_vm4, %v841_v56, %v843_v24  ;;  %v784_v18 = vsel %vm375_vm6, %v781_v22, %v4198_v14  ;;  %v785_v35 = vsel %vm375_vm6, %v4133_v2, %v781_v22  ;;  %v777_v51 = vpop.permute.xlu2 %776 }
 0x2fa   :  { %v861_v28 = vmul.f32 %v853_v17, %v844_v27  ;;  %v800_v45 = vmul.f32 %v792_v33, %v785_v35  ;;  %v801_v46 = vmul.f32 %v793_v34, %v784_v18  ;;  %v787_v3 = vsel %vm375_vm6, %v4198_v14, %v777_v51 }
 0x2fb   :  { %v798_v61 = vmul.f32 %v790_v63, %v787_v3 }
 0x2fc   :  { %1108 = vmatpush.msrb.mxu3 %v861_v28 }
 0x300   :  { %v751_v30 = vpop.permute.xlu1 %750  ;;  %v811_v31 = vpop.permute.xlu0 %810 }
 0x301   :  { %v814_v36 = vsel %vm407_vm5, %v811_v31, %v813_v5  ;;  %v815_v37 = vsel %vm407_vm5, %v4152_v26, %v811_v31  ;;  %v754_v42 = vsel %vm344_vm7, %v751_v30, %v4208_v19  ;;  %v755_v43 = vsel %vm344_vm7, %v4148_v23, %v751_v30 }
 0x302   :  { %v830_v38 = vmul.f32 %v822_v54, %v815_v37  ;;  %v831_v39 = vmul.f32 %v823_v12, %v814_v36  ;;  %v770_v44 = vmul.f32 %v762_v40, %v755_v43  ;;  %v771_v47 = vmul.f32 %v763_v41, %v754_v42 }
 0x304   :  { %1089 = vmatpush.msrb.mxu2 %v830_v38  ;;  %1109 = vmatpush.msrb.mxu3 %v831_v39 }
 0x306   :  { %1090 = vmatpush.msrb.mxu2 %v800_v45  ;;  %1110 = vmatpush.msrb.mxu3 %v801_v46 }
 0x308   :  { %v807_v11 = vpop.permute.xlu1 %806  ;;  %v837_v32 = vpop.permute.xlu0 %836  ;;  %1091 = vmatpush.msrb.mxu2 %v770_v44  ;;  %1111 = vmatpush.msrb.mxu3 %v771_v47 }
 0x309   :  { %v816_v55 = vsel %vm407_vm5, %v807_v11, %v4152_v26  ;;  %v817_v56 = vsel %vm407_vm5, %v813_v5, %v807_v11  ;;  %v846_v57 = vsel %vm439_vm4, %v837_v32, %v4121_v59  ;;  %v847_v58 = vsel %vm439_vm4, %v843_v24, %v837_v32  ;;  %2578 = vmatmul.msk.f32.vlgmr.msrb.gmra.mxu2 %vm638_vm8, %v990_v25 }
 0x30a   :  { %2579 = vmatmul.msk.f32.vlgmr.msrb.gmra.mxu3 %vm638_vm8, %v990_v25  ;;  %v858_v60 = vmul.f32 %v850_v49, %v847_v58  ;;  %v859_v62 = vmul.f32 %v851_v50, %v846_v57  ;;  %v786_v26 = vsel %vm375_vm6, %v777_v51, %v4133_v2  ;;  %v828_v59 = vmul.f32 %v820_v16, %v817_v56 }
 0x30b   :  { %v829_v4 = vmul.f32 %v821_v52, %v816_v55  ;;  %v799_v5 = vmul.f32 %v791_v0, %v786_v26 }
 0x30c   :  { %1048 = vmatpush.msrb.mxu0 %v858_v60  ;;  %1068 = vmatpush.msrb.mxu1 %v859_v62 }
 0x30e   :  { %1049 = vmatpush.msrb.mxu0 %v828_v59  ;;  %1069 = vmatpush.msrb.mxu1 %v829_v4 }
 0x310   :  { %v747_v7 = vpop.permute.xlu0 %746  ;;  %1050 = vmatpush.msrb.mxu0 %v798_v61  ;;  %1070 = vmatpush.msrb.mxu1 %v799_v5  ;;  %v1031_v53 = vpop.permute.xlu1 %1030 }
 0x311   :  { %v756_v2 = vsel %vm344_vm7, %v747_v7, %v4148_v23  ;;  %v757_v8 = vsel %vm344_vm7, %v4208_v19, %v747_v7 }
 0x312   :  { %v768_v9 = vmul.f32 %v760_v6, %v757_v8  ;;  %v769_v10 = vmul.f32 %v761_v1, %v756_v2 }
 0x314   :  { %1051 = vmatpush.msrb.mxu0 %v768_v9  ;;  %1071 = vmatpush.msrb.mxu1 %v769_v10 }
 0x315   :  { %2576 = vmatmul.msk.f32.vlgmr.msrb.gmra.mxu0 %vm638_vm8, %v990_v25  ;;  %2577 = vmatmul.msk.f32.vlgmr.msrb.gmra.mxu1 %vm638_vm8, %v990_v25 }
 0x38c   :  { %v1093_v14 = vpop.f32.mrf.mxu2 }
 0x38d   :  { %v1094_v15 = vadd.f32 %v1093_v14, %v1031_v53  ;;  %v1113_v17 = vpop.f32.mrf.mxu3 }
 0x38e   :  { %v1114_v22 = vadd.f32 %v1113_v17, %v1031_v53 }
 0x38f   :  { %v1138_v24 = vmax.f32 %v1094_v15, 0.0 }
 0x390   :  { %v4264_v27 = vmax.f32 %v1114_v22, 0.0 }
 0x391   :  { %v1184_v23 = vrot.slane %v1138_v24, 7  ;;  %v2586_v28 = vrot.slane %v1138_v24, 9  ;;  %v2588_v19 = vrot.slane %v1138_v24, 10  ;;  %v2590_v20 = vrot.slane %v1138_v24, 11 }
 0x392   :  { %v1053_v21 = vpop.f32.mrf.mxu0  ;;  %v1073_v29 = vpop.f32.mrf.mxu1  ;;  %v2592_v54 = vrot.slane %v1138_v24, 12  ;;  %v1185_v12 = vrot.slane %v4264_v27, 7  ;;  %v2594_v13 = vrot.slane %v1138_v24, 13  ;;  %v2587_v30 = vrot.slane %v4264_v27, 9 }
 0x393   :  { %v1054_v31 = vadd.f32 %v1053_v21, %v1031_v53  ;;  %v1074_v33 = vadd.f32 %v1073_v29, %v1031_v53  ;;  %v1198_v34 = vrot.slane %v1184_v23, 7  ;;  %v2589_v18 = vrot.slane %v4264_v27, 10 }
 0x394   :  { %v2591_v35 = vrot.slane %v4264_v27, 11  ;;  %v2593_v36 = vrot.slane %v4264_v27, 12  ;;  %v2595_v37 = vrot.slane %v4264_v27, 13  ;;  %v1199_v41 = vrot.slane %v1185_v12, 7 }
 0x395   :  { %v1116_v38 = vmul.f32 %v1054_v31, %v1054_v31  ;;  %v1118_v39 = vmul.f32 %v1094_v15, %v1054_v31  ;;  %v1136_v40 = vmax.f32 %v1054_v31, 0.0  ;;  %v1117_v42 = vmul.f32 %v1074_v33, %v1074_v33 }
 0x396   :  { %v1119_v43 = vmul.f32 %v1114_v22, %v1074_v33  ;;  %v1137_v45 = vmax.f32 %v1074_v33, 0.0 }
 0x397   :  { %vm1120_vm14 = vcmp.gt.f32.partialorder %v1116_v38, 0.0  ;;  %vm1122_vm15 = vcmp.gt.f32.partialorder %v1118_v39, 0.0  ;;  %v1142_v46 = vrot.slane %v1136_v40, 1  ;;  %v1146_v44 = vrot.slane %v1136_v40, 2 }
 0x398   :  { %v2580_v47 = vsel %vm1120_vm14, 1.0, %v3341_v48  ;;  %v2582_v25 = vsel %vm1122_vm15, 1.0, %v3341_v48  ;;  %v1150_v49 = vrot.slane %v1136_v40, 3  ;;  %v1154_v50 = vrot.slane %v1136_v40, 4 }
 0x399   :  { %v1158_v51 = vrot.slane %v1136_v40, 5  ;;  %v1162_v11 = vrot.slane %v1136_v40, 6  ;;  %v1166_v32 = vrot.slane %v1136_v40, 7  ;;  %v4275_v16 = vsel %vm1216_vm13, %v1136_v40, %v1184_v23 }
 0x39a   :  { %v4278_v52 = vsel %vm1216_vm13, %v1142_v46, %v1138_v24  ;;  %v4281_v55 = vsel %vm1216_vm13, %v1146_v44, %v2586_v28  ;;  %v4284_v56 = vsel %vm1216_vm13, %v1150_v49, %v2588_v19  ;;  %v4287_v57 = vsel %vm1216_vm13, %v1154_v50, %v2590_v20 }
 0x39b   :  { %v4290_v58 = vsel %vm1216_vm13, %v1158_v51, %v2592_v54  ;;  %v4293_v60 = vsel %vm1216_vm13, %v1162_v11, %v2594_v13  ;;  %v4296_v62 = vsel %vm1216_vm13, %v1166_v32, %v1198_v34  ;;  %vm1121_vm0 = vcmp.gt.f32.partialorder %v1117_v42, 0.0 }
 0x39c   :  { %vm1123_vm1 = vcmp.gt.f32.partialorder %v1119_v43, 0.0  ;;  %v2581_v63 = vsel %vm1121_vm0, 1.0, %v3341_v48  ;;  %v1143_v0 = vrot.slane %v1137_v45, 1  ;;  %v1147_v26 = vrot.slane %v1137_v45, 2 }
 0x39d   :  { %v2583_v3 = vsel %vm1123_vm1, 1.0, %v3341_v48  ;;  %v1132_v59 = vpack.c.bf16 %v2581_v63, %v2580_v47  ;;  %v1151_v4 = vrot.slane %v1137_v45, 3  ;;  %v1155_v61 = vrot.slane %v1137_v45, 4 }
 0x39e   :  { %v1133_v5 = vpack.c.bf16 %v2583_v3, %v2582_v25  ;;  %v1159_v6 = vrot.slane %v1137_v45, 5  ;;  %v1163_v1 = vrot.slane %v1137_v45, 6  ;;  %v1167_v7 = vrot.slane %v1137_v45, 7 }
 0x39f   :  { %1134 = vst [vmem:[#allocation7] sm:$0xff] %v1132_v59  ;;  %v4301_v2 = vsel %vm1216_vm13, %v1137_v45, %v1185_v12  ;;  %v4305_v8 = vsel %vm1216_vm13, %v1143_v0, %v4264_v27  ;;  %v4308_v9 = vsel %vm1216_vm13, %v1147_v26, %v2587_v30  ;;  %v4311_v10 = vsel %vm1216_vm13, %v1151_v4, %v2589_v18 }
 0x3a0   :  { %1135 = vst [vmem:[#allocation7 + $0x8] sm:$0xff] %v1133_v5  ;;  %v4314_v53 = vsel %vm1216_vm13, %v1155_v61, %v2591_v35  ;;  %v4317_v14 = vsel %vm1216_vm13, %v1159_v6, %v2593_v36  ;;  %v4320_v15 = vsel %vm1216_vm13, %v1163_v1, %v2595_v37  ;;  %v4323_v17 = vsel %vm1216_vm13, %v1167_v7, %v1199_v41 }
 0x3a1   :  { %3326 = dma.done.wait [#allocation4], 16384 }
 0x3a2   :  { %3327 = vsyncadd [#allocation4], 4294950912  ;;  %v3117_v22 = vld [vmem:[#allocation3 + $0x48] sm:$0xff]  ;;  %v3125_v24 = vld [vmem:[#allocation3 + $0x60] sm:$0xff]  ;;  %v1239_v63 = vpack.c.bf16 %v4278_v52, %v4278_v52  ;;  %v1237_v0 = vpack.c.bf16 %v4275_v16, %v4275_v16  ;;  %v1240_v26 = vpack.c.bf16 %v4305_v8, %v4305_v8  ;;  %v1238_v3 = vpack.c.bf16 %v4301_v2, %v4301_v2  ;;  %s3342_s6 = smov [#allocation7]   ;;  %s2515_s25 = sshll.u32 %s4381_s11, 4  ;;  %s2516_s25 = int_to_ptr.hbm [resolvable:$true] %s2515_s25 }
 0x3a3   :  { %v3133_v27 = vld [vmem:[#allocation3 + $0x168] sm:$0xff]  ;;  %v3141_v23 = vld [vmem:[#allocation3 + $0x280] sm:$0xff]  ;;  %2281 = vmatpush.bf16.msra.mxu0 %v3117_v22  ;;  %2294 = vmatpush.bf16.msra.mxu1 %v3125_v24  ;;  %v3116_v28 = vld [vmem:[#allocation3 + $0x330] sm:$0xff]  ;;  %s2513_s23 = sshll.u32 %s3342_s6, 4  ;;  %s2504_s4 = sshll.u32 %s4380_s10, 4  ;;  %vm2495_vm3 = vcmask 253952   ;;  %s2514_s23 = int_to_ptr.vmem [resolvable:$true] %s2513_s23  ;;  %s2505_s4 = int_to_ptr.hbm [resolvable:$true] %s2504_s4 }
 0x3a4   :  { %v3124_v21 = vld [vmem:[#allocation3 + $0x108] sm:$0xff]  ;;  %2307 = vmatpush.bf16.msra.mxu2 %v3133_v27  ;;  %2320 = vmatpush.bf16.msra.mxu3 %v3141_v23  ;;  %v3132_v29 = vld [vmem:[#allocation3 + $0x1b8] sm:$0xff]  ;;  %v3140_v19 = vld [vmem:[#allocation3 + $0x1c0] sm:$0xff]  ;;  %2518 = dma.vmem_to_hbm [thread:$0]  %s2514_s23, 256, %s2516_s25, [#allocation8]  }
 0x3a5   :  { %v3115_v20 = vld [vmem:[#allocation3 + $0x368] sm:$0xff]  ;;  %v3123_v54 = vld [vmem:[#allocation3 + $0x150] sm:$0xff]  ;;  %v3139_v13 = vld [vmem:[#allocation3 + $0xc0] sm:$0xff]  ;;  %s3343_s2 = smov [#allocation5]   ;;  %s2526_s20 = sshll.u32 %s4382_s12, 4  ;;  %s2527_s20 = int_to_ptr.hbm [resolvable:$true] %s2526_s20 }
 0x3a6   :  { %v3131_v12 = vld [vmem:[#allocation3 + $0x1a8] sm:$0xff]  ;;  %v3114_v30 = vld [vmem:[#allocation3 + $0x50] sm:$0xff]  ;;  %v3122_v31 = vld [vmem:[#allocation3 + $0x320] sm:$0xff]  ;;  %s2502_s15 = sshll.u32 %s3343_s2, 4  ;;  %s2503_s15 = int_to_ptr.vmem [resolvable:$true] %s2502_s15 }
 0x3a7   :  { %2282 = vmatpush.bf16.msra.mxu0 %v3116_v28  ;;  %2295 = vmatpush.bf16.msra.mxu1 %v3124_v21  ;;  %v3130_v33 = vld [vmem:[#allocation3 + $0x80] sm:$0xff]  ;;  %v3138_v34 = vld [vmem:[#allocation3 + $0x138] sm:$0xff]  ;;  %v3137_v37 = vld [vmem:[#allocation3 + $0x28] sm:$0xff]  ;;  %2507 = dma.vmem_to_hbm [thread:$0]  %s2503_s15, 256, %s2505_s4, [#allocation6]  }
 0x3a8   :  { %2308 = vmatpush.bf16.msra.mxu2 %v3132_v29  ;;  %2321 = vmatpush.bf16.msra.mxu3 %v3140_v19  ;;  %v3113_v18 = vld [vmem:[#allocation3 + $0x18] sm:$0xff]  ;;  %v3129_v36 = vld [vmem:[#allocation3 + $0x340] sm:$0xff]  ;;  %v3136_v41 = vld [vmem:[#allocation3 + $0x290] sm:$0xff] }
 0x3a9   :  { %v3121_v35 = vld [vmem:[#allocation3 + $0x98] sm:$0xff]  ;;  %v3111_v42 = vld [vmem:[#allocation3 + $0x3b0] sm:$0xff]  ;;  %v3127_v45 = vld [vmem:[#allocation3 + $0x388] sm:$0xff] }
 0x3aa   :  { %v3112_v38 = vld [vmem:[#allocation3 + $0xd8] sm:$0xff]  ;;  %v3119_v43 = vld [vmem:[#allocation3 + $0x110] sm:$0xff]  ;;  %v3118_v47 = vld [vmem:[#allocation3 + $0x380] sm:$0xff] }
 0x3ab   :  { %2283 = vmatpush.bf16.msra.mxu0 %v3115_v20  ;;  %2296 = vmatpush.bf16.msra.mxu1 %v3123_v54  ;;  %v3120_v39 = vld [vmem:[#allocation3 + $0x118] sm:$0xff]  ;;  %v3110_v44 = vld [vmem:[#allocation3 + $0x2b0] sm:$0xff]  ;;  %v3126_v25 = vld [vmem:[#allocation3 + $0x2e0] sm:$0xff] }
 0x3ac   :  { %2309 = vmatpush.bf16.msra.mxu2 %v3131_v12  ;;  %2322 = vmatpush.bf16.msra.mxu3 %v3139_v13  ;;  %v3128_v40 = vld [vmem:[#allocation3 + $0x338] sm:$0xff]  ;;  %v3134_v49 = vld [vmem:[#allocation3 + $0x3e8] sm:$0xff]  ;;  %v3157_v51 = vld [vmem:[#allocation3 + $0x10] sm:$0xff] }
 0x3ad   :  { %v3135_v46 = vld [vmem:[#allocation3 + $0x2f8] sm:$0xff]  ;;  %v3149_v50 = vld [vmem:[#allocation3 + $0x128] sm:$0xff]  ;;  %v3165_v11 = vld [vmem:[#allocation3 + $0x2f0] sm:$0xff] }
 0x3ae   :  { %v3173_v32 = vld [vmem:[#allocation3 + $0x2a8] sm:$0xff]  ;;  %v3156_v4 = vld [vmem:[#allocation3 + $0x1f0] sm:$0xff]  ;;  %v3172_v5 = vld [vmem:[#allocation3 + $0x140] sm:$0xff] }
 0x3af   :  { %2284 = vmatpush.bf16.msra.mxu0 %v3114_v30  ;;  %2297 = vmatpush.bf16.msra.mxu1 %v3122_v31  ;;  %v3148_v59 = vld [vmem:[#allocation3 + $0x8] sm:$0xff]  ;;  %v3147_v16 = vld [vmem:[#allocation3 + $0x3f8] sm:$0xff]  ;;  %v3155_v52 = vld [vmem:[#allocation3 + $0x1e0] sm:$0xff] }
 0x3b0   :  { %2310 = vmatpush.bf16.msra.mxu2 %v3130_v33  ;;  %2323 = vmatpush.bf16.msra.mxu3 %v3138_v34  ;;  %v3164_v61 = vld [vmem:[#allocation3 + $0x88] sm:$0xff]  ;;  %v3163_v6 = vld [vmem:[#allocation3 + $0xd0] sm:$0xff]  ;;  %v3146_v7 = vld [vmem:[#allocation3 + $0x218] sm:$0xff] }
 0x3b1   :  { %v3171_v1 = vld [vmem:[#allocation3 + $0x30] sm:$0xff]  ;;  %v3162_v8 = vld [vmem:[#allocation3 + $0x208] sm:$0xff]  ;;  %v3170_v22 = vld [vmem:[#allocation3 + $0x1d8] sm:$0xff] }
 0x3b2   :  { %v3154_v2 = vld [vmem:[#allocation3 + $0xb0] sm:$0xff]  ;;  %v3145_v24 = vld [vmem:[#allocation3 + $0x3e0] sm:$0xff]  ;;  %v3169_v28 = vld [vmem:[#allocation3 + $0x188] sm:$0xff] }
 0x3b3   :  { %2285 = vmatpush.bf16.msra.mxu0 %v3113_v18  ;;  %2298 = vmatpush.bf16.msra.mxu1 %v3121_v35  ;;  %v3153_v27 = vld [vmem:[#allocation3 + $0x2c0] sm:$0xff]  ;;  %v3144_v21 = vld [vmem:[#allocation3 + $0x158] sm:$0xff]  ;;  %v3160_v19 = vld [vmem:[#allocation3 + $0x90] sm:$0xff] }
 0x3b4   :  { %2311 = vmatpush.bf16.msra.mxu2 %v3129_v36  ;;  %2324 = vmatpush.bf16.msra.mxu3 %v3137_v37  ;;  %v3161_v23 = vld [vmem:[#allocation3 + $0x3a0] sm:$0xff]  ;;  %v3168_v20 = vld [vmem:[#allocation3 + $0x350] sm:$0xff]  ;;  %v3167_v30 = vld [vmem:[#allocation3 + $0x268] sm:$0xff] }
 0x3b5   :  { %v3152_v29 = vld [vmem:[#allocation3 + $0xa0] sm:$0xff]  ;;  %v3151_v12 = vld [vmem:[#allocation3 + $0x3f0] sm:$0xff]  ;;  %v3166_v18 = vld [vmem:[#allocation3 + $0x358] sm:$0xff] }
 0x3b6   :  { %v3143_v54 = vld [vmem:[#allocation3 + $0x3c0] sm:$0xff]  ;;  %v3158_v34 = vld [vmem:[#allocation3 + $0x230] sm:$0xff]  ;;  %v3181_v35 = vld [vmem:[#allocation3 + $0x178] sm:$0xff] }
 0x3b7   :  { %2286 = vmatpush.bf16.msra.mxu0 %v3112_v38  ;;  %2299 = vmatpush.bf16.msra.mxu1 %v3120_v39  ;;  %v3159_v13 = vld [vmem:[#allocation3 + $0x240] sm:$0xff]  ;;  %v3189_v36 = vld [vmem:[#allocation3 + $0xe8] sm:$0xff]  ;;  %v1243_v39 = vpack.c.bf16 %v4284_v56, %v4284_v56 }
 0x3b8   :  { %2312 = vmatpush.bf16.msra.mxu2 %v3128_v40  ;;  %2325 = vmatpush.bf16.msra.mxu3 %v3136_v41  ;;  %v3142_v31 = vld [vmem:[#allocation3 + $0x100] sm:$0xff]  ;;  %v3197_v37 = vld [vmem:[#allocation3 + $0x1e8] sm:$0xff]  ;;  %v1241_v40 = vpack.c.bf16 %v4281_v55, %v4281_v55  ;;  %v1244_v41 = vpack.c.bf16 %v4311_v10, %v4311_v10  ;;  %v3195_v10 = vld [vmem:[#allocation3 + $0x210] sm:$0xff] }
 0x3b9   :  { %v3150_v33 = vld [vmem:[#allocation3 + $0x2a0] sm:$0xff]  ;;  %v3205_v38 = vld [vmem:[#allocation3 + $0x2e8] sm:$0xff] }
 0x3ba   :  { %v3179_v55 = vld [vmem:[#allocation3 + $0x300] sm:$0xff] }
 0x3bb   :  { %2287 = vmatpush.bf16.msra.mxu0 %v3111_v42  ;;  %2300 = vmatpush.bf16.msra.mxu1 %v3119_v43  ;;  %v1242_v42 = vpack.c.bf16 %v4308_v9, %v4308_v9  ;;  %v3180_v43 = vld [vmem:[#allocation3 + $0xe0] sm:$0xff] }
 0x3bc   :  { %2313 = vmatpush.bf16.msra.mxu2 %v3127_v45  ;;  %2326 = vmatpush.bf16.msra.mxu3 %v3135_v46  ;;  %v3188_v45 = vld [vmem:[#allocation3 + $0x20] sm:$0xff]  ;;  %v3196_v46 = vld [vmem:[#allocation3 + $0x3d8] sm:$0xff] }
 0x3bd   :  { %v3187_v56 = vld [vmem:[#allocation3 + $0x40] sm:$0xff] }
 0x3be   :  { %v3203_v9 = vld [vmem:[#allocation3 + $0x120] sm:$0xff] }
 0x3bf   :  { %2288 = vmatpush.bf16.msra.mxu0 %v3110_v44  ;;  %2301 = vmatpush.bf16.msra.mxu1 %v3118_v47  ;;  %v3204_v44 = vld [vmem:[#allocation3 + $0x198] sm:$0xff]  ;;  %v3178_v47 = vld [vmem:[#allocation3 + $0x70] sm:$0xff] }
 0x3c0   :  { %2314 = vmatpush.bf16.msra.mxu2 %v3126_v25  ;;  %2327 = vmatpush.bf16.msra.mxu3 %v3134_v49  ;;  %v3186_v25 = vld [vmem:[#allocation3 + $0x248] sm:$0xff] }
 0x3c1   :  { %v3194_v49 = vld [vmem:[#allocation3 + $0x2c8] sm:$0xff] }
 0x3c2   :  { %2289 = vmatmul.bf16.vlgmr.msra.gmra.mxu0 %v1237_v0  ;;  %2302 = vmatmul.bf16.vlgmr.msra.gmra.mxu1 %v1238_v3  ;;  %v3176_v0 = vld [vmem:[#allocation3 + $0x318] sm:$0xff]  ;;  %v3192_v3 = vld [vmem:[#allocation3 + $0x3c8] sm:$0xff] }
 0x3c3   :  { %2333 = vmatpush.bf16.msrb.mxu0 %v3149_v50  ;;  %2346 = vmatpush.bf16.msrb.mxu1 %v3157_v51  ;;  %v3202_v50 = vld [vmem:[#allocation3 + $0x58] sm:$0xff]  ;;  %v3177_v51 = vld [vmem:[#allocation3 + $0x220] sm:$0xff] }
 0x3c4   :  { %2359 = vmatpush.bf16.msrb.mxu2 %v3165_v11  ;;  %2372 = vmatpush.bf16.msrb.mxu3 %v3173_v32  ;;  %v3185_v11 = vld [vmem:[#allocation3 + $0x2b8] sm:$0xff]  ;;  %v3193_v32 = vld [vmem:[#allocation3 + $0x160] sm:$0xff] }
 0x3c5   :  { %2315 = vmatmul.bf16.vlgmr.msra.gmra.mxu2 %v1239_v63  ;;  %2328 = vmatmul.bf16.vlgmr.msra.gmra.mxu3 %v1240_v26  ;;  %v3201_v63 = vld [vmem:[#allocation3 + $0x1d0] sm:$0xff]  ;;  %v3184_v26 = vld [vmem:[#allocation3 + $0x3b8] sm:$0xff] }
 0x3c7   :  { %2334 = vmatpush.bf16.msrb.mxu0 %v3148_v59  ;;  %2347 = vmatpush.bf16.msrb.mxu1 %v3156_v4  ;;  %v3200_v59 = vld [vmem:[#allocation3 + $0x2d0] sm:$0xff]  ;;  %v3175_v4 = vld [vmem:[#allocation3 + $0x200] sm:$0xff] }
 0x3c8   :  { %2360 = vmatpush.bf16.msrb.mxu2 %v3164_v61  ;;  %2373 = vmatpush.bf16.msrb.mxu3 %v3172_v5  ;;  %v3183_v61 = vld [vmem:[#allocation3 + $0x260] sm:$0xff]  ;;  %v3191_v5 = vld [vmem:[#allocation3 + $0x3a8] sm:$0xff] }
 0x3cb   :  { %2335 = vmatpush.bf16.msrb.mxu0 %v3147_v16  ;;  %2348 = vmatpush.bf16.msrb.mxu1 %v3155_v52  ;;  %v3199_v16 = vld [vmem:[#allocation3 + $0x1c8] sm:$0xff]  ;;  %v3174_v52 = vld [vmem:[#allocation3 + $0x130] sm:$0xff] }
 0x3cc   :  { %2361 = vmatpush.bf16.msrb.mxu2 %v3163_v6  ;;  %2374 = vmatpush.bf16.msrb.mxu3 %v3171_v1  ;;  %v3182_v6 = vld [vmem:[#allocation3 + $0x328] sm:$0xff] }
 0x3cd   :  { %v3190_v1 = vld [vmem:[#allocation3 + $0x288] sm:$0xff] }
 0x3cf   :  { %2336 = vmatpush.bf16.msrb.mxu0 %v3146_v7  ;;  %2349 = vmatpush.bf16.msrb.mxu1 %v3154_v2  ;;  %v3198_v7 = vld [vmem:[#allocation3 + $0x1b0] sm:$0xff]  ;;  %v3213_v2 = vld [vmem:[#allocation3 + $0x2d8] sm:$0xff] }
 0x3d0   :  { %2362 = vmatpush.bf16.msrb.mxu2 %v3162_v8  ;;  %2375 = vmatpush.bf16.msrb.mxu3 %v3170_v22  ;;  %v3221_v8 = vld [vmem:[#allocation3 + $0x38] sm:$0xff]  ;;  %v3229_v22 = vld [vmem:[#allocation3 + $0x348] sm:$0xff] }
 0x3d3   :  { %2337 = vmatpush.bf16.msrb.mxu0 %v3145_v24  ;;  %2350 = vmatpush.bf16.msrb.mxu1 %v3153_v27  ;;  %v3237_v24 = vld [vmem:[#allocation3 + $0x190] sm:$0xff]  ;;  %v1245_v27 = vpack.c.bf16 %v4287_v57, %v4287_v57  ;;  %v3211_v57 = vld [vmem:[#allocation3 + $0xa8] sm:$0xff] }
 0x3d4   :  { %2363 = vmatpush.bf16.msrb.mxu2 %v3161_v23  ;;  %2376 = vmatpush.bf16.msrb.mxu3 %v3169_v28  ;;  %v1247_v23 = vpack.c.bf16 %v4290_v58, %v4290_v58  ;;  %v1246_v28 = vpack.c.bf16 %v4314_v53, %v4314_v53  ;;  %v3219_v58 = vld [vmem:[#allocation3 + $0x378] sm:$0xff]  ;;  %v3227_v53 = vld [vmem:[#allocation3 + $0x360] sm:$0xff] }
 0x3d7   :  { %2338 = vmatpush.bf16.msrb.mxu0 %v3144_v21  ;;  %2351 = vmatpush.bf16.msrb.mxu1 %v3152_v29  ;;  %v1248_v21 = vpack.c.bf16 %v4317_v14, %v4317_v14  ;;  %v3212_v29 = vld [vmem:[#allocation3 + $0x258] sm:$0xff]  ;;  %v3235_v14 = vld [vmem:[#allocation3 + $0x270] sm:$0xff] }
 0x3d8   :  { %2364 = vmatpush.bf16.msrb.mxu2 %v3160_v19  ;;  %2377 = vmatpush.bf16.msrb.mxu3 %v3168_v20  ;;  %v3220_v19 = vld [vmem:[#allocation3 + $0xb8] sm:$0xff]  ;;  %v3228_v20 = vld [vmem:[#allocation3 + $0x228] sm:$0xff] }
 0x3db   :  { %2339 = vmatpush.bf16.msrb.mxu0 %v3143_v54  ;;  %2352 = vmatpush.bf16.msrb.mxu1 %v3151_v12  ;;  %v3236_v54 = vld [vmem:[#allocation3 + $0x310] sm:$0xff]  ;;  %v3210_v12 = vld [vmem:[#allocation3 + $0x1a0] sm:$0xff] }
 0x3dc   :  { %2365 = vmatpush.bf16.msrb.mxu2 %v3159_v13  ;;  %2378 = vmatpush.bf16.msrb.mxu3 %v3167_v30  ;;  %v3218_v13 = vld [vmem:[#allocation3 + $0x250] sm:$0xff]  ;;  %v3226_v30 = vld [vmem:[#allocation3 + $0x278] sm:$0xff] }
 0x3df   :  { %2340 = vmatpush.bf16.msrb.mxu0 %v3142_v31  ;;  %2353 = vmatpush.bf16.msrb.mxu1 %v3150_v33  ;;  %v3234_v31 = vld [vmem:[#allocation3 + $0x298] sm:$0xff]  ;;  %v3209_v33 = vld [vmem:[#allocation3 + $0x390] sm:$0xff] }
 0x3e0   :  { %2366 = vmatpush.bf16.msrb.mxu2 %v3158_v34  ;;  %2379 = vmatpush.bf16.msrb.mxu3 %v3166_v18  ;;  %v3217_v34 = vld [vmem:[#allocation3 + $0x3d0] sm:$0xff]  ;;  %v3225_v18 = vld [vmem:[#allocation3 + $0xc8] sm:$0xff] }
 0x3e2   :  { %2341 = vmatmul.bf16.vlgmr.msrb.gmra.mxu0 %v1241_v40  ;;  %2354 = vmatmul.bf16.vlgmr.msrb.gmra.mxu1 %v1242_v42  ;;  %v3207_v40 = vld [vmem:[#allocation3 + $0x238] sm:$0xff]  ;;  %v3223_v42 = vld [vmem:[#allocation3 + $0x308] sm:$0xff] }
 0x3e3   :  { %2385 = vmatpush.bf16.msra.mxu0 %v3181_v35  ;;  %2398 = vmatpush.bf16.msra.mxu1 %v3189_v36  ;;  %v3233_v35 = vld [vmem:[#allocation3] sm:$0xff]  ;;  %v3208_v36 = vld [vmem:[#allocation3 + $0x398] sm:$0xff] }
 0x3e4   :  { %2411 = vmatpush.bf16.msra.mxu2 %v3197_v37  ;;  %2424 = vmatpush.bf16.msra.mxu3 %v3205_v38  ;;  %v3216_v37 = vld [vmem:[#allocation3 + $0x170] sm:$0xff] }
 0x3e5   :  { %2367 = vmatmul.bf16.vlgmr.msrb.gmra.mxu2 %v1243_v39  ;;  %2380 = vmatmul.bf16.vlgmr.msrb.gmra.mxu3 %v1244_v41  ;;  %v3224_v38 = vld [vmem:[#allocation3 + $0x370] sm:$0xff]  ;;  %v3232_v39 = vld [vmem:[#allocation3 + $0x68] sm:$0xff]  ;;  %v3215_v41 = vld [vmem:[#allocation3 + $0x180] sm:$0xff] }
 0x3e7   :  { %2386 = vmatpush.bf16.msra.mxu0 %v3180_v43  ;;  %2399 = vmatpush.bf16.msra.mxu1 %v3188_v45  ;;  %v3231_v43 = vld [vmem:[#allocation3 + $0xf8] sm:$0xff] }
 0x3e8   :  { %2412 = vmatpush.bf16.msra.mxu2 %v3196_v46  ;;  %2425 = vmatpush.bf16.msra.mxu3 %v3204_v44  ;;  %v3206_v45 = vld [vmem:[#allocation3 + $0x1f8] sm:$0xff]  ;;  %v3214_v46 = vld [vmem:[#allocation3 + $0xf0] sm:$0xff] }
 0x3e9   :  { %v3222_v44 = vld [vmem:[#allocation3 + $0x78] sm:$0xff] }
 0x3eb   :  { %2387 = vmatpush.bf16.msra.mxu0 %v3179_v55  ;;  %2400 = vmatpush.bf16.msra.mxu1 %v3187_v56  ;;  %v3230_v55 = vld [vmem:[#allocation3 + $0x148] sm:$0xff]  ;;  %v1249_v56 = vpack.c.bf16 %v4293_v60, %v4293_v60  ;;  %v3253_v60 = vld [vmem:[%s4379_s9] ss:$0 sm:$0xff]  ;;  %s3344_s9 = smov [#allocation9]  }
 0x3ec   :  { %2413 = vmatpush.bf16.msra.mxu2 %v3195_v10  ;;  %2426 = vmatpush.bf16.msra.mxu3 %v3203_v9  ;;  %v1250_v10 = vpack.c.bf16 %v4320_v15, %v4320_v15  ;;  %v1251_v9 = vpack.c.bf16 %v4296_v62, %v4296_v62  ;;  %s2524_s10 = sshll.u32 %s3344_s9, 4  ;;  %s2525_s10 = int_to_ptr.vmem [resolvable:$true] %s2524_s10 }
 0x3ef   :  { %2388 = vmatpush.bf16.msra.mxu0 %v3178_v47  ;;  %2401 = vmatpush.bf16.msra.mxu1 %v3186_v25  ;;  %v1252_v47 = vpack.c.bf16 %v4323_v17, %v4323_v17 }
 0x3f0   :  { %2414 = vmatpush.bf16.msra.mxu2 %v3194_v49  ;;  %2427 = vmatpush.bf16.msra.mxu3 %v3202_v50 }
 0x3f3   :  { %2389 = vmatpush.bf16.msra.mxu0 %v3177_v51  ;;  %2402 = vmatpush.bf16.msra.mxu1 %v3185_v11 }
 0x3f4   :  { %2415 = vmatpush.bf16.msra.mxu2 %v3193_v32  ;;  %2428 = vmatpush.bf16.msra.mxu3 %v3201_v63 }
 0x3f7   :  { %2390 = vmatpush.bf16.msra.mxu0 %v3176_v0  ;;  %2403 = vmatpush.bf16.msra.mxu1 %v3184_v26 }
 0x3f8   :  { %2416 = vmatpush.bf16.msra.mxu2 %v3192_v3  ;;  %2429 = vmatpush.bf16.msra.mxu3 %v3200_v59 }
 0x3fb   :  { %2391 = vmatpush.bf16.msra.mxu0 %v3175_v4  ;;  %2404 = vmatpush.bf16.msra.mxu1 %v3183_v61 }
 0x3fc   :  { %2417 = vmatpush.bf16.msra.mxu2 %v3191_v5  ;;  %2430 = vmatpush.bf16.msra.mxu3 %v3199_v16 }
 0x3ff   :  { %2392 = vmatpush.bf16.msra.mxu0 %v3174_v52  ;;  %2405 = vmatpush.bf16.msra.mxu1 %v3182_v6 }
 0x400   :  { %2418 = vmatpush.bf16.msra.mxu2 %v3190_v1  ;;  %2431 = vmatpush.bf16.msra.mxu3 %v3198_v7 }
 0x402   :  { %2393 = vmatmul.bf16.vlgmr.msra.gmra.mxu0 %v1245_v27  ;;  %2406 = vmatmul.bf16.vlgmr.msra.gmra.mxu1 %v1246_v28 }
 0x403   :  { %2437 = vmatpush.bf16.msrb.mxu0 %v3213_v2  ;;  %2450 = vmatpush.bf16.msrb.mxu1 %v3221_v8 }
 0x404   :  { %2463 = vmatpush.bf16.msrb.mxu2 %v3229_v22  ;;  %2476 = vmatpush.bf16.msrb.mxu3 %v3237_v24 }
 0x405   :  { %2419 = vmatmul.bf16.vlgmr.msra.gmra.mxu2 %v1247_v23  ;;  %2432 = vmatmul.bf16.vlgmr.msra.gmra.mxu3 %v1248_v21 }
 0x407   :  { %2438 = vmatpush.bf16.msrb.mxu0 %v3212_v29  ;;  %2451 = vmatpush.bf16.msrb.mxu1 %v3220_v19 }
 0x408   :  { %2464 = vmatpush.bf16.msrb.mxu2 %v3228_v20  ;;  %2477 = vmatpush.bf16.msrb.mxu3 %v3236_v54 }
 0x40b   :  { %2439 = vmatpush.bf16.msrb.mxu0 %v3211_v57  ;;  %2452 = vmatpush.bf16.msrb.mxu1 %v3219_v58 }
 0x40c   :  { %2465 = vmatpush.bf16.msrb.mxu2 %v3227_v53  ;;  %2478 = vmatpush.bf16.msrb.mxu3 %v3235_v14 }
 0x40f   :  { %2440 = vmatpush.bf16.msrb.mxu0 %v3210_v12  ;;  %2453 = vmatpush.bf16.msrb.mxu1 %v3218_v13 }
 0x410   :  { %2466 = vmatpush.bf16.msrb.mxu2 %v3226_v30  ;;  %2479 = vmatpush.bf16.msrb.mxu3 %v3234_v31 }
 0x413   :  { %2441 = vmatpush.bf16.msrb.mxu0 %v3209_v33  ;;  %2454 = vmatpush.bf16.msrb.mxu1 %v3217_v34 }
 0x414   :  { %2467 = vmatpush.bf16.msrb.mxu2 %v3225_v18  ;;  %2480 = vmatpush.bf16.msrb.mxu3 %v3233_v35 }
 0x417   :  { %2442 = vmatpush.bf16.msrb.mxu0 %v3208_v36  ;;  %2455 = vmatpush.bf16.msrb.mxu1 %v3216_v37 }
 0x418   :  { %2468 = vmatpush.bf16.msrb.mxu2 %v3224_v38  ;;  %2481 = vmatpush.bf16.msrb.mxu3 %v3232_v39 }
 0x41b   :  { %2443 = vmatpush.bf16.msrb.mxu0 %v3207_v40  ;;  %2456 = vmatpush.bf16.msrb.mxu1 %v3215_v41 }
 0x41c   :  { %2469 = vmatpush.bf16.msrb.mxu2 %v3223_v42  ;;  %2482 = vmatpush.bf16.msrb.mxu3 %v3231_v43 }
 0x41f   :  { %2444 = vmatpush.bf16.msrb.mxu0 %v3206_v45  ;;  %2457 = vmatpush.bf16.msrb.mxu1 %v3214_v46 }
 0x420   :  { %2470 = vmatpush.bf16.msrb.mxu2 %v3222_v44  ;;  %2483 = vmatpush.bf16.msrb.mxu3 %v3230_v55 }
 0x422   :  { %2445 = vmatmul.bf16.vlgmr.msrb.gmra.mxu0 %v1249_v56  ;;  %2458 = vmatmul.bf16.vlgmr.msrb.gmra.mxu1 %v1250_v10 }
 0x423   :  { %2471 = vmatmul.bf16.vlgmr.msrb.gmra.mxu2 %v1251_v9  ;;  %2484 = vmatmul.bf16.vlgmr.msrb.gmra.mxu3 %v1252_v47 }
 0x43f   :  { %v2290_v62 = vpop.f32.mrf.mxu0  ;;  %v2303_v17 = vpop.f32.mrf.mxu1 }
 0x440   :  { %v2291_v15 = vadd.f32 %v3253_v60, %v2290_v62 }
 0x442   :  { %v2304_v25 = vadd.f32 %v2303_v17, %v2291_v15 }
 0x447   :  { %v2292_v11 = vpop.f32.mrf.mxu0  ;;  %v2305_v63 = vpop.f32.mrf.mxu1 }
 0x448   :  { %v2316_v49 = vpop.f32.mrf.mxu2  ;;  %v2329_v51 = vpop.f32.mrf.mxu3 }
 0x449   :  { %v2317_v50 = vadd.f32 %v2316_v49, %v2304_v25 }
 0x44b   :  { %v2330_v32 = vadd.f32 %v2329_v51, %v2317_v50 }
 0x450   :  { %v2318_v0 = vpop.f32.mrf.mxu2  ;;  %v2331_v26 = vpop.f32.mrf.mxu3 }
 0x45f   :  { %v2342_v3 = vpop.f32.mrf.mxu0  ;;  %v2355_v59 = vpop.f32.mrf.mxu1 }
 0x460   :  { %v2343_v2 = vadd.f32 %v2342_v3, %v2330_v32 }
 0x462   :  { %v2356_v27 = vadd.f32 %v2355_v59, %v2343_v2 }
 0x467   :  { %v2344_v5 = vpop.f32.mrf.mxu0  ;;  %v2357_v16 = vpop.f32.mrf.mxu1 }
 0x468   :  { %v2368_v4 = vpop.f32.mrf.mxu2  ;;  %v2381_v61 = vpop.f32.mrf.mxu3 }
 0x469   :  { %v2369_v28 = vadd.f32 %v2368_v4, %v2356_v27 }
 0x46b   :  { %v2382_v19 = vadd.f32 %v2381_v61, %v2369_v28 }
 0x470   :  { %v2370_v52 = vpop.f32.mrf.mxu2  ;;  %v2383_v6 = vpop.f32.mrf.mxu3 }
 0x47f   :  { %v2394_v1 = vpop.f32.mrf.mxu0  ;;  %v2407_v7 = vpop.f32.mrf.mxu1 }
 0x480   :  { %v2395_v20 = vadd.f32 %v2394_v1, %v2382_v19 }
 0x482   :  { %v2408_v54 = vadd.f32 %v2407_v7, %v2395_v20 }
 0x487   :  { %v2396_v24 = vpop.f32.mrf.mxu0  ;;  %v2409_v23 = vpop.f32.mrf.mxu1 }
 0x488   :  { %v2420_v8 = vpop.f32.mrf.mxu2  ;;  %v2433_v22 = vpop.f32.mrf.mxu3 }
 0x489   :  { %v2421_v57 = vadd.f32 %v2420_v8, %v2408_v54 }
 0x48b   :  { %v2434_v58 = vadd.f32 %v2433_v22, %v2421_v57 }
 0x490   :  { %v2422_v21 = vpop.f32.mrf.mxu2  ;;  %v2435_v29 = vpop.f32.mrf.mxu3 }
 0x49f   :  { %v2446_v53 = vpop.f32.mrf.mxu0  ;;  %v2459_v14 = vpop.f32.mrf.mxu1 }
 0x4a0   :  { %v2447_v12 = vadd.f32 %v2446_v53, %v2434_v58 }
 0x4a2   :  { %v2460_v13 = vadd.f32 %v2459_v14, %v2447_v12 }
 0x4a6   :  { %v2472_v30 = vpop.f32.mrf.mxu2  ;;  %v2485_v31 = vpop.f32.mrf.mxu3 }
 0x4a7   :  { %v2473_v33 = vadd.f32 %v2472_v30, %v2460_v13  ;;  %v2448_v34 = vpop.f32.mrf.mxu0  ;;  %v2461_v18 = vpop.f32.mrf.mxu1 }
 0x4a9   :  { %v2486_v35 = vadd.f32 %v2485_v31, %v2473_v33 }
 0x4ab   :  { %v2489_v36 = vperm.slane %v2486_v35, 0 }
 0x4ad   :  { %v2490_v37 = vmul.f32 %v2489_v36, %v2486_v35 }
 0x4ae   :  { %v2474_v38 = vpop.f32.mrf.mxu2  ;;  %v2487_v39 = vpop.f32.mrf.mxu3 }
 0x4af   :  { %vm2491_vm2 = vcmp.gt.f32.partialorder %v2490_v37, 0.0 }
 0x4b0   :  { %v3108_v40 = vsel %vm2491_vm2, 1.0, %v3341_v48 }
 0x4b1   :  { %v2494_v41 = vpack.c.bf16 %v3108_v40, %v3108_v40 }
 0x4b3   :  { %2496 = vst.msk [vmem:[#allocation9] sm:$0x1] %vm2495_vm3, %v2494_v41 }
 0x4b4   :  { %2529 = dma.vmem_to_hbm [thread:$0]  %s2525_s10, 16, %s2527_s20, [#allocation8]  }
 0x4b5   :  { %3328 = dma.done.wait [#allocation6], 256  }
 0x4b6   :  { %3329 = vsyncadd [#allocation6], 4294967040 }
 0x4b7   :  { %3330 = dma.done.wait [#allocation8], 272  }
 0x4b8   :  { %3331 = vsyncadd [#allocation8], 4294967024 }
 0x4b9   :  { %2542 = vsyncpa [#allocation6], 1 }
 0x4ba   :  { %2543 = vsyncpa [#allocation8], 1 }
 0x4bb   :  { %2544 = vsyncmov [#allocation4] }
 0x4be   :  { %s2545_s0 = vpop.sfrf %2544 }
 0x4bf   :  { %p3109_p0 = scmp.ne.s32.totalorder %s2545_s0, 0 }
 0x4c1   :  { %2549 = shalt.err (%p3109_p0)  }

</bundles_post_ra>
